<compile_context>
chip_gen: v6e
topology: v6e:2x2x1
jax: 0.10.0
libtpu: 0.0.40
codegen_flags: <defaults>
</compile_context>

<pallas_src>
import functools

import jax
import jax.numpy as jnp
from jax.experimental import pallas as pl
from jax.experimental.pallas import tpu as pltpu


def _round_up(x, m):
    return ((x + m - 1) // m) * m


def _temporal_block_kernel(x_ref, w1_ref, b1_ref, w2_ref, b2_ref, *rest,
                           kernel_size, dilation, padding, use_downsample):
    """One (batch-block, L-tile) per grid step.

    x_ref    : (Bb, Lt, Cin_p)       current input tile, channels padded to 128-mult
    w1_ref   : (K, Cin_p, Cout_p)    conv1 weight (tap-major, channels-last matmul form)
    w2_ref   : (K, Cout_p, Cout_p)   conv2 weight
    wd_ref   : (1, Cin_p, Cout_p)    1x1 residual projection (only if use_downsample)
    b*_ref   : (1, Cout_p)           f32 biases
    out_ref  : (Bb, Lt, Cout_p)      output tile (compute/out dtype)
    xpad_sc  : (Bb, Lt+padding, Cin_p)  persistent VMEM scratch: [x halo ; x tile]
    h1pad_sc : (Bb, Lt+padding, Cout_p) persistent VMEM scratch: [h1 halo ; h1 tile]
    """
    if use_downsample:
        wd_ref, bd_ref, out_ref, xpad_sc, h1pad_sc = rest
    else:
        wd_ref = bd_ref = None
        out_ref, xpad_sc, h1pad_sc = rest

    Bb, Lt, Cin_p = x_ref.shape
    Cout_p = out_ref.shape[2]
    cdt = x_ref.dtype                      # MXU operand dtype (bf16 fast path / f32)
    l = pl.program_id(1)                   # L-tile index ("arbitrary": sequential)

    # ---- causal halo management: zero at the first L-tile of every batch block, ----
    # ---- otherwise carry the previous tile's tail (scratch persists across steps) ----
    if padding > 0:
        @pl.when(l == 0)
        def _zero_halo():
            xpad_sc[:, :padding, :] = jnp.zeros((Bb, padding, Cin_p), cdt)
            h1pad_sc[:, :padding, :] = jnp.zeros((Bb, padding, Cout_p), cdt)

        @pl.when(l > 0)
        def _carry_halo():
            # Last `padding` rows of the previous tile are still resident in scratch.
            xpad_sc[:, :padding, :] = xpad_sc[:, Lt:, :]
            h1pad_sc[:, :padding, :] = h1pad_sc[:, Lt:, :]

    # Stage the current x tile behind the halo.
    # TODO(synk): DMA x straight into xpad_sc (pl.ANY + make_async_copy) or use the
    # roll-the-output scheme to remove this VMEM->VMEM copy from the vst slot.
    x_tile = x_ref[...]
    xpad_sc[:, padding:, :] = x_tile

    # ---- conv1: K dilated taps as lane-dense matmuls, f32 accumulation ----
    acc1 = None
    for k in range(kernel_size):
        o = k * dilation
        tap = xpad_sc[:, o:o + Lt, :].reshape(Bb * Lt, Cin_p)
        t = jnp.dot(tap, w1_ref[k], preferred_element_type=jnp.float32)
        acc1 = t if acc1 is None else acc1 + t
    h1 = jnp.maximum(acc1 + b1_ref[...], 0.0)          # (Bb*Lt, Cout_p) f32
    # dropout1: identity in inference mode.

    # ---- stage causally-padded h1 for conv2 (halo handled above) ----
    h1pad_sc[:, padding:, :] = h1.reshape(Bb, Lt, Cout_p).astype(cdt)

    # ---- conv2: K dilated taps + bias + ReLU ----
    acc2 = None
    for k in range(kernel_size):
        o = k * dilation
        tap = h1pad_sc[:, o:o + Lt, :].reshape(Bb * Lt, Cout_p)
        t = jnp.dot(tap, w2_ref[k], preferred_element_type=jnp.float32)
        acc2 = t if acc2 is None else acc2 + t
    h2 = jnp.maximum(acc2 + b2_ref[...], 0.0)
    # dropout2: identity in inference mode.

    # ---- residual: 1x1 conv iff Cin != Cout, else identity add ----
    # Note: on the bf16 path the residual uses x already cast to compute_dtype (and the
    # 1x1 projection runs on bf16 operands with f32 accumulation) — a small, documented
    # precision difference vs. PyTorch's full-f32 residual.
    x2d = x_tile.reshape(Bb * Lt, Cin_p)
    if use_downsample:
        res = jnp.dot(x2d, wd_ref[0], preferred_element_type=jnp.float32) + bd_ref[...]
    else:
        res = x2d.astype(jnp.float32)                   # Cin_p == Cout_p here

    out = jnp.maximum(h2 + res, 0.0)
    out_ref[...] = out.reshape(Bb, Lt, Cout_p).astype(out_ref.dtype)


def temporal_block_pallas(x_nlc, w1, b1, w2, b2, wd=None, bd=None, *,
                          kernel_size, dilation, padding,
                          compute_dtype=jnp.bfloat16, out_dtype=None,
                          block_batch=None, block_len=None, keep_padded=False):
    """Fused TemporalBlock forward.

    x_nlc : (B, L, Cin) float32, channels-last.
    w1    : (K, Cin, Cout)   weight-normalized conv1 weight (tap-major).
    w2    : (K, Cout, Cout)  weight-normalized conv2 weight.
    wd/bd : (1, Cin, Cout)/(Cout,) 1x1 downsample, or None when Cin == Cout.
    b1/b2 : (Cout,) biases.
    Returns (B, L, Cout) in out_dtype (default compute_dtype), or the padded
    (Bp, L_pad, Cout_p) slab when keep_padded=True (for stacking TCN blocks).
    """
    B, L, Cin = x_nlc.shape
    Cout = w1.shape[2]
    K = kernel_size
    if padding != (K - 1) * dilation:
        raise ValueError(
            f"TemporalBlock requires padding == (kernel_size-1)*dilation; got "
            f"padding={padding}, kernel_size={K}, dilation={dilation}")
    use_downsample = wd is not None
    if not use_downsample and Cin != Cout:
        raise ValueError("identity residual requires Cin == Cout")
    if out_dtype is None:
        out_dtype = compute_dtype

    # Lane-dense channel padding (last/lane dim a multiple of 128).
    Cin_p = _round_up(Cin, 128)
    Cout_p = _round_up(Cout, 128)
    cbytes = jnp.dtype(compute_dtype).itemsize
    obytes = jnp.dtype(out_dtype).itemsize

    # ---- generation-aware VMEM budget / core count (best effort) ----
    vmem_cap = 128 * 1024 * 1024
    num_cores = 1
    try:
        info = pltpu.get_tpu_info()
        vmem_cap = int(getattr(info, "vmem_capacity_bytes", vmem_cap) or vmem_cap)
        num_cores = int(getattr(info, "num_cores",
                                getattr(info, "tensor_cores_per_chip", 1)) or 1)
    except Exception:
        pass
    if vmem_cap <= 64 * 1024 * 1024:      # v7x-class: 64 MiB/TC -> leave headroom
        vmem_limit = 40 * 1024 * 1024
        target_rows = 1024
    else:                                  # v5e/v6e-class: 128 MiB -> use most of it
        vmem_limit = 100 * 1024 * 1024
        target_rows = 2048

    # ---- L-tiling: tiles of Lt rows (multiple of 8, >= causal halo) ----
    min_lt = max(8, _round_up(max(padding, 1), 8))
    if block_len is None:
        block_len = min(_round_up(L, 8), 512)
    Lt = max(min_lt, _round_up(block_len, 8))

    # ---- batch rows per grid step (M = Bb*Lt rows per matmul) ----
    if block_batch is None:
        bb = max(1, min(B, max(1, target_rows // Lt)))
        if num_cores > 1 and B >= num_cores:
            # Keep at least num_cores "parallel" batch steps so no TensorCore idles.
            bb = max(1, min(bb, B // num_cores))
        block_batch = bb
    Bb = max(1, int(block_batch))

    # ---- shrink tiles until the (double-buffered) working set fits the budget ----
    wbytes = (K * Cin_p * Cout_p + K * Cout_p * Cout_p
              + (Cin_p * Cout_p if use_downsample else 0)) * cbytes

    def _est(bb, lt):
        return (2 * bb * lt * Cin_p * cbytes          # x input block, double-buffered
                + 2 * bb * lt * Cout_p * obytes       # output block, double-buffered
                + 2 * wbytes                          # weights (conservative: 2 bufs)
                + bb * (lt + padding) * (Cin_p + Cout_p) * cbytes   # halo scratches
                + (1 << 20))                          # slack

    for _ in range(20):
        if _est(Bb, Lt) <= vmem_limit:
            break
        if Bb > 1:
            Bb = (Bb + 1) // 2
        elif Lt > min_lt:
            Lt = max(min_lt, _round_up(Lt // 2, 8))
        else:
            break

    L_pad = _round_up(max(L, Lt), Lt)
    Bp = _round_up(B, Bb)

    # ---- wrapper-side padding glue (zeros are causally harmless at the L tail) ----
    xp = jnp.zeros((Bp, L_pad, Cin_p), compute_dtype).at[:B, :L, :Cin].set(
        x_nlc.astype(compute_dtype))
    w1p = jnp.zeros((K, Cin_p, Cout_p), compute_dtype).at[:, :Cin, :Cout].set(
        w1.astype(compute_dtype))
    w2p = jnp.zeros((K, Cout_p, Cout_p), compute_dtype).at[:, :Cout, :Cout].set(
        w2.astype(compute_dtype))
    b1p = jnp.zeros((1, Cout_p), jnp.float32).at[:, :Cout].set(
        b1.reshape(1, -1).astype(jnp.float32))
    b2p = jnp.zeros((1, Cout_p), jnp.float32).at[:, :Cout].set(
        b2.reshape(1, -1).astype(jnp.float32))

    args = [xp, w1p, b1p, w2p, b2p]
    if use_downsample:
        wdp = jnp.zeros((1, Cin_p, Cout_p), compute_dtype).at[:, :Cin, :Cout].set(
            wd.astype(compute_dtype))
        bdp = jnp.zeros((1, Cout_p), jnp.float32).at[:, :Cout].set(
            bd.reshape(1, -1).astype(jnp.float32))
        args += [wdp, bdp]

    kern = functools.partial(_temporal_block_kernel,
                             kernel_size=K,
                             dilation=dilation,
                             padding=padding,
                             use_downsample=use_downsample)
    grid = (Bp // Bb, L_pad // Lt)

    def _call(single_buffer_weights):
        wmode = dict(pipeline_mode=pl.Buffered(1)) if single_buffer_weights else {}
        in_specs = [
            pl.BlockSpec((Bb, Lt, Cin_p), lambda i, l: (i, l, 0)),
            pl.BlockSpec((K, Cin_p, Cout_p), lambda i, l: (0, 0, 0), **wmode),
            pl.BlockSpec((1, Cout_p), lambda i, l: (0, 0), **wmode),
            pl.BlockSpec((K, Cout_p, Cout_p), lambda i, l: (0, 0, 0), **wmode),
            pl.BlockSpec((1, Cout_p), lambda i, l: (0, 0), **wmode),
        ]
        if use_downsample:
            in_specs += [
                pl.BlockSpec((1, Cin_p, Cout_p), lambda i, l: (0, 0, 0), **wmode),
                pl.BlockSpec((1, Cout_p), lambda i, l: (0, 0), **wmode),
            ]
        return pl.pallas_call(
            kern,
            out_shape=jax.ShapeDtypeStruct((Bp, L_pad, Cout_p), out_dtype),
            grid_spec=pltpu.PrefetchScalarGridSpec(
                num_scalar_prefetch=0,
                grid=grid,
                in_specs=in_specs,
                out_specs=pl.BlockSpec((Bb, Lt, Cout_p), lambda i, l: (i, l, 0)),
                scratch_shapes=[
                    pltpu.VMEM((Bb, Lt + padding, Cin_p), compute_dtype),
                    pltpu.VMEM((Bb, Lt + padding, Cout_p), compute_dtype),
                ],
            ),
            compiler_params=pltpu.CompilerParams(
                dimension_semantics=("parallel", "arbitrary"),
                vmem_limit_bytes=vmem_limit,
            ),
        )(*args)

    try:
        out = _call(True)      # single-buffered weights/biases (constant index_map)
    except Exception:
        out = _call(False)     # fallback if pipeline_mode=pl.Buffered(1) unsupported

    if keep_padded:
        return out             # (Bp, L_pad, Cout_p) padded layout for stacked blocks
    return out[:B, :L, :Cout]


def _weight_norm(v, g):
    """PyTorch weight_norm (dim=0): W[o] = g[o] * V[o] / ||V[o]||_2 over (Cin, K)."""
    norm = jnp.sqrt(jnp.sum(v * v, axis=(1, 2), keepdims=True))
    return g.reshape(-1, 1, 1) * v / norm


def _ref_forward(x_ncl, w1_ock, b1, w2_ock, b2, wd_ock, bd, dilation, padding):
    """Pure-JAX reference with PyTorch (Cout, Cin, K) weights, NCL layout."""
    hp = jax.lax.Precision.HIGHEST

    def causal_conv(x, w, b):
        L = x.shape[2]
        Kk = w.shape[2]
        xpd = jnp.pad(x, ((0, 0), (0, 0), (padding, 0)))
        out = jnp.zeros((x.shape[0], w.shape[0], L), jnp.float32)
        for k in range(Kk):
            o = k * dilation
            out = out + jnp.einsum('bcl,oc->bol', xpd[:, :, o:o + L], w[:, :, k],
                                   precision=hp)
        return out + b[None, :, None]

    h1 = jnp.maximum(causal_conv(x_ncl, w1_ock, b1), 0.0)
    h2 = jnp.maximum(causal_conv(h1, w2_ock, b2), 0.0)
    if wd_ock is None:
        res = x_ncl
    else:
        res = jnp.einsum('bcl,oc->bol', x_ncl, wd_ock[:, :, 0], precision=hp) \
            + bd[None, :, None]
    return jnp.maximum(h2 + res, 0.0)


def _make_params(key, n_inputs, n_outputs, kernel_size, with_downsample):
    ks = jax.random.split(key, 8)
    v1 = 0.01 * jax.random.normal(ks[0], (n_outputs, n_inputs, kernel_size), jnp.float32)
    g1 = 1.0 + 0.1 * jax.random.normal(ks[1], (n_outputs,), jnp.float32)
    b1 = 0.1 * jax.random.normal(ks[2], (n_outputs,), jnp.float32)
    v2 = 0.01 * jax.random.normal(ks[3], (n_outputs, n_outputs, kernel_size), jnp.float32)
    g2 = 1.0 + 0.1 * jax.random.normal(ks[4], (n_outputs,), jnp.float32)
    b2 = 0.1 * jax.random.normal(ks[5], (n_outputs,), jnp.float32)
    if with_downsample:
        wd = 0.01 * jax.random.normal(ks[6], (n_outputs, n_inputs, 1), jnp.float32)
        bd = 0.1 * jax.random.normal(ks[7], (n_outputs,), jnp.float32)
    else:
        wd, bd = None, None
    return _weight_norm(v1, g1), b1, _weight_norm(v2, g2), b2, wd, bd


def _run_case(key, n_inputs, n_outputs, kernel_size, dilation, B, L, block_len=None):
    padding = (kernel_size - 1) * dilation
    with_downsample = n_inputs != n_outputs
    w1_ock, b1, w2_ock, b2, wd_ock, bd = _make_params(
        key, n_inputs, n_outputs, kernel_size, with_downsample)

    # Re-layout for the channels-last matmul kernel: (K, Cin, Cout).
    w1_k = jnp.transpose(w1_ock, (2, 1, 0))
    w2_k = jnp.transpose(w2_ock, (2, 1, 0))
    wd_k = None if wd_ock is None else jnp.transpose(wd_ock, (2, 1, 0))

    x_ncl = jax.random.normal(jax.random.fold_in(key, 123),
                              (B, n_inputs, L), jnp.float32)
    x_nlc = jnp.transpose(x_ncl, (0, 2, 1))

    ref = _ref_forward(x_ncl, w1_ock, b1, w2_ock, b2, wd_ock, bd, dilation, padding)

    # f32 MXU-operand path: exact check (also exercises multi-tile halo carry).
    out_f32 = temporal_block_pallas(
        x_nlc, w1_k, b1, w2_k, b2, wd_k, bd,
        kernel_size=kernel_size, dilation=dilation, padding=padding,
        compute_dtype=jnp.float32, out_dtype=jnp.float32, block_len=block_len)
    out_f32 = jnp.transpose(out_f32, (0, 2, 1))
    jax.block_until_ready(out_f32)
    assert out_f32.shape == (B, n_outputs, L)
    assert jnp.allclose(out_f32, ref, atol=1e-5, rtol=1e-5)

    # bf16 MXU-operand path with bf16 output (v6e/v7x perf path): loose check.
    out_bf16 = temporal_block_pallas(
        x_nlc, w1_k, b1, w2_k, b2, wd_k, bd,
        kernel_size=kernel_size, dilation=dilation, padding=padding,
        compute_dtype=jnp.bfloat16, block_len=block_len)
    out_bf16 = jnp.transpose(out_bf16.astype(jnp.float32), (0, 2, 1))
    jax.block_until_ready(out_bf16)
    assert out_bf16.shape == (B, n_outputs, L)
    assert jnp.allclose(out_bf16, ref, atol=2e-2, rtol=2e-2)


if __name__ == "__main__":
    # Case 1: Cin != Cout -> 1x1 downsample residual; small L-tiles (block_len=16) force
    # a 3-tile L grid so the causal-halo carry path is exercised (padding=4, L_pad=48).
    _run_case(jax.random.PRNGKey(0),
              n_inputs=4, n_outputs=8, kernel_size=3, dilation=2, B=2, L=40,
              block_len=16)

    # Case 2: Cin == Cout -> identity residual (no downsample matmul), single L tile.
    _run_case(jax.random.PRNGKey(1),
              n_inputs=8, n_outputs=8, kernel_size=3, dilation=1, B=3, L=16)

    print("KERNEL_OK")
</pallas_src>

<mosaic_0001>
module attributes {stable_mosaic.version = 11 : i64} {
  func.func @_temporal_block_kernel(%arg0: i32, %arg1: i32, %arg2: memref<2x16x128xf32, #tpu.memory_space<vmem>>, %arg3: memref<3x128x128xf32, #tpu.memory_space<vmem>>, %arg4: memref<1x128xf32, #tpu.memory_space<vmem>>, %arg5: memref<3x128x128xf32, #tpu.memory_space<vmem>>, %arg6: memref<1x128xf32, #tpu.memory_space<vmem>>, %arg7: memref<1x128x128xf32, #tpu.memory_space<vmem>>, %arg8: memref<1x128xf32, #tpu.memory_space<vmem>>, %arg9: memref<2x16x128xf32, #tpu.memory_space<vmem>>, %arg10: memref<2x20x128xf32, #tpu.memory_space<vmem>>, %arg11: memref<2x20x128xf32, #tpu.memory_space<vmem>>) attributes {dimension_semantics = [#tpu.dimension_semantics<parallel>, #tpu.dimension_semantics<arbitrary>], iteration_bounds = array<i64: 1, 3>, scalar_prefetch = 0 : i64, scratch_operands = 2 : i64, tpu.core_type = #tpu.core_type<tc>, window_params = [{transform_indices = @transform_0, window_bounds = array<i64: 2, 16, 128>}, {pipeline_mode = #tpu.pipeline_mode<synchronous>, transform_indices = @transform_1, window_bounds = array<i64: 3, 128, 128>}, {pipeline_mode = #tpu.pipeline_mode<synchronous>, transform_indices = @transform_2, window_bounds = array<i64: 1, 128>}, {pipeline_mode = #tpu.pipeline_mode<synchronous>, transform_indices = @transform_3, window_bounds = array<i64: 3, 128, 128>}, {pipeline_mode = #tpu.pipeline_mode<synchronous>, transform_indices = @transform_4, window_bounds = array<i64: 1, 128>}, {pipeline_mode = #tpu.pipeline_mode<synchronous>, transform_indices = @transform_5, window_bounds = array<i64: 1, 128, 128>}, {pipeline_mode = #tpu.pipeline_mode<synchronous>, transform_indices = @transform_6, window_bounds = array<i64: 1, 128>}, {transform_indices = @transform_7, window_bounds = array<i64: 2, 16, 128>}]} {
    %c0_i32 = arith.constant 0 : i32
    %0 = arith.cmpi eq, %arg1, %c0_i32 : i32
    %1 = arith.extui %0 : i1 to i32
    %c0_i32_0 = arith.constant 0 : i32
    %2 = arith.cmpi ne, %1, %c0_i32_0 : i32
    scf.if %2 {
      %cst_65 = arith.constant 0.000000e+00 : f32
      %66 = vector.broadcast %cst_65 : f32 to vector<2x4x128xf32>
      %c0_66 = arith.constant 0 : index
      %c0_67 = arith.constant 0 : index
      %c0_68 = arith.constant 0 : index
      %67 = vector.load %arg10[%c0_66, %c0_67, %c0_68] : memref<2x20x128xf32, #tpu.memory_space<vmem>>, vector<2x4x128xf32>
      tpu.vector_store %arg10[%c0_66, %c0_67, %c0_68], %66 {strides = array<i32>} : memref<2x20x128xf32, #tpu.memory_space<vmem>>, vector<2x4x128xf32>,
      %cst_69 = arith.constant 0.000000e+00 : f32
      %68 = vector.broadcast %cst_69 : f32 to vector<2x4x128xf32>
      %c0_70 = arith.constant 0 : index
      %c0_71 = arith.constant 0 : index
      %c0_72 = arith.constant 0 : index
      %69 = vector.load %arg11[%c0_70, %c0_71, %c0_72] : memref<2x20x128xf32, #tpu.memory_space<vmem>>, vector<2x4x128xf32>
      tpu.vector_store %arg11[%c0_70, %c0_71, %c0_72], %68 {strides = array<i32>} : memref<2x20x128xf32, #tpu.memory_space<vmem>>, vector<2x4x128xf32>,
    } else {
    }
    %c0_i32_1 = arith.constant 0 : i32
    %3 = arith.cmpi sgt, %arg1, %c0_i32_1 : i32
    %4 = arith.extui %3 : i1 to i32
    %c0_i32_2 = arith.constant 0 : i32
    %5 = arith.cmpi ne, %4, %c0_i32_2 : i32
    scf.if %5 {
      %c0_65 = arith.constant 0 : index
      %c16 = arith.constant 16 : index
      %c0_66 = arith.constant 0 : index
      %66 = vector.load %arg10[%c0_65, %c16, %c0_66] : memref<2x20x128xf32, #tpu.memory_space<vmem>>, vector<2x4x128xf32>
      %c0_67 = arith.constant 0 : index
      %c0_68 = arith.constant 0 : index
      %c0_69 = arith.constant 0 : index
      %67 = vector.load %arg10[%c0_67, %c0_68, %c0_69] : memref<2x20x128xf32, #tpu.memory_space<vmem>>, vector<2x4x128xf32>
      tpu.vector_store %arg10[%c0_67, %c0_68, %c0_69], %66 {strides = array<i32>} : memref<2x20x128xf32, #tpu.memory_space<vmem>>, vector<2x4x128xf32>,
      %c0_70 = arith.constant 0 : index
      %c16_71 = arith.constant 16 : index
      %c0_72 = arith.constant 0 : index
      %68 = vector.load %arg11[%c0_70, %c16_71, %c0_72] : memref<2x20x128xf32, #tpu.memory_space<vmem>>, vector<2x4x128xf32>
      %c0_73 = arith.constant 0 : index
      %c0_74 = arith.constant 0 : index
      %c0_75 = arith.constant 0 : index
      %69 = vector.load %arg11[%c0_73, %c0_74, %c0_75] : memref<2x20x128xf32, #tpu.memory_space<vmem>>, vector<2x4x128xf32>
      tpu.vector_store %arg11[%c0_73, %c0_74, %c0_75], %68 {strides = array<i32>} : memref<2x20x128xf32, #tpu.memory_space<vmem>>, vector<2x4x128xf32>,
    } else {
    }
    %c0 = arith.constant 0 : index
    %c0_3 = arith.constant 0 : index
    %c0_4 = arith.constant 0 : index
    %6 = vector.load %arg2[%c0, %c0_3, %c0_4] : memref<2x16x128xf32, #tpu.memory_space<vmem>>, vector<2x16x128xf32>
    %c0_5 = arith.constant 0 : index
    %c4 = arith.constant 4 : index
    %c0_6 = arith.constant 0 : index
    %7 = vector.load %arg10[%c0_5, %c4, %c0_6] : memref<2x20x128xf32, #tpu.memory_space<vmem>>, vector<2x16x128xf32>
    tpu.vector_store %arg10[%c0_5, %c4, %c0_6], %6 {strides = array<i32>} : memref<2x20x128xf32, #tpu.memory_space<vmem>>, vector<2x16x128xf32>,
    %c0_7 = arith.constant 0 : index
    %c0_8 = arith.constant 0 : index
    %c0_9 = arith.constant 0 : index
    %8 = vector.load %arg10[%c0_7, %c0_8, %c0_9] : memref<2x20x128xf32, #tpu.memory_space<vmem>>, vector<2x16x128xf32>
    %9 = vector.shape_cast %8 : vector<2x16x128xf32> to vector<32x128xf32>
    %c0_10 = arith.constant 0 : index
    %c0_11 = arith.constant 0 : index
    %c0_12 = arith.constant 0 : index
    %10 = vector.load %arg3[%c0_10, %c0_11, %c0_12] : memref<3x128x128xf32, #tpu.memory_space<vmem>>, vector<1x128x128xf32>
    %11 = vector.shape_cast %10 : vector<1x128x128xf32> to vector<128x128xf32>
    %cst = arith.constant dense<0.000000e+00> : vector<32x128xf32>
    %12 = tpu.matmul %9, %11, %cst {dimension_numbers = #tpu.dot_dimension_numbers<[1], [0], [0], [1], [0, 0, 1, 1], [], []>} : vector<32x128xf32>, vector<128x128xf32>, vector<32x128xf32> -> vector<32x128xf32>
    %c0_13 = arith.constant 0 : index
    %c2 = arith.constant 2 : index
    %c0_14 = arith.constant 0 : index
    %13 = vector.load %arg10[%c0_13, %c2, %c0_14] : memref<2x20x128xf32, #tpu.memory_space<vmem>>, vector<2x16x128xf32>
    %14 = vector.shape_cast %13 : vector<2x16x128xf32> to vector<32x128xf32>
    %c1 = arith.constant 1 : index
    %c0_15 = arith.constant 0 : index
    %c0_16 = arith.constant 0 : index
    %15 = vector.load %arg3[%c1, %c0_15, %c0_16] : memref<3x128x128xf32, #tpu.memory_space<vmem>>, vector<1x128x128xf32>
    %16 = vector.shape_cast %15 : vector<1x128x128xf32> to vector<128x128xf32>
    %cst_17 = arith.constant dense<0.000000e+00> : vector<32x128xf32>
    %17 = tpu.matmul %14, %16, %cst_17 {dimension_numbers = #tpu.dot_dimension_numbers<[1], [0], [0], [1], [0, 0, 1, 1], [], []>} : vector<32x128xf32>, vector<128x128xf32>, vector<32x128xf32> -> vector<32x128xf32>
    %18 = arith.addf %12, %17 : vector<32x128xf32>
    %c0_18 = arith.constant 0 : index
    %c4_19 = arith.constant 4 : index
    %c0_20 = arith.constant 0 : index
    %19 = vector.load %arg10[%c0_18, %c4_19, %c0_20] : memref<2x20x128xf32, #tpu.memory_space<vmem>>, vector<2x16x128xf32>
    %20 = vector.shape_cast %19 : vector<2x16x128xf32> to vector<32x128xf32>
    %c2_21 = arith.constant 2 : index
    %c0_22 = arith.constant 0 : index
    %c0_23 = arith.constant 0 : index
    %21 = vector.load %arg3[%c2_21, %c0_22, %c0_23] : memref<3x128x128xf32, #tpu.memory_space<vmem>>, vector<1x128x128xf32>
    %22 = vector.shape_cast %21 : vector<1x128x128xf32> to vector<128x128xf32>
    %cst_24 = arith.constant dense<0.000000e+00> : vector<32x128xf32>
    %23 = tpu.matmul %20, %22, %cst_24 {dimension_numbers = #tpu.dot_dimension_numbers<[1], [0], [0], [1], [0, 0, 1, 1], [], []>} : vector<32x128xf32>, vector<128x128xf32>, vector<32x128xf32> -> vector<32x128xf32>
    %24 = arith.addf %18, %23 : vector<32x128xf32>
    %c0_25 = arith.constant 0 : index
    %c0_26 = arith.constant 0 : index
    %25 = vector.load %arg4[%c0_25, %c0_26] : memref<1x128xf32, #tpu.memory_space<vmem>>, vector<1x128xf32>
    %26 = vector.broadcast %25 : vector<1x128xf32> to vector<32x128xf32>
    %27 = arith.addf %24, %26 : vector<32x128xf32>
    %cst_27 = arith.constant 0.000000e+00 : f32
    %28 = vector.broadcast %cst_27 : f32 to vector<32x128xf32>
    %29 = arith.maximumf %27, %28 : vector<32x128xf32>
    %30 = vector.shape_cast %29 : vector<32x128xf32> to vector<2x16x128xf32>
    %c0_28 = arith.constant 0 : index
    %c4_29 = arith.constant 4 : index
    %c0_30 = arith.constant 0 : index
    %31 = vector.load %arg11[%c0_28, %c4_29, %c0_30] : memref<2x20x128xf32, #tpu.memory_space<vmem>>, vector<2x16x128xf32>
    tpu.vector_store %arg11[%c0_28, %c4_29, %c0_30], %30 {strides = array<i32>} : memref<2x20x128xf32, #tpu.memory_space<vmem>>, vector<2x16x128xf32>,
    %c0_31 = arith.constant 0 : index
    %c0_32 = arith.constant 0 : index
    %c0_33 = arith.constant 0 : index
    %32 = vector.load %arg11[%c0_31, %c0_32, %c0_33] : memref<2x20x128xf32, #tpu.memory_space<vmem>>, vector<2x16x128xf32>
    %33 = vector.shape_cast %32 : vector<2x16x128xf32> to vector<32x128xf32>
    %c0_34 = arith.constant 0 : index
    %c0_35 = arith.constant 0 : index
    %c0_36 = arith.constant 0 : index
    %34 = vector.load %arg5[%c0_34, %c0_35, %c0_36] : memref<3x128x128xf32, #tpu.memory_space<vmem>>, vector<1x128x128xf32>
    %35 = vector.shape_cast %34 : vector<1x128x128xf32> to vector<128x128xf32>
    %cst_37 = arith.constant dense<0.000000e+00> : vector<32x128xf32>
    %36 = tpu.matmul %33, %35, %cst_37 {dimension_numbers = #tpu.dot_dimension_numbers<[1], [0], [0], [1], [0, 0, 1, 1], [], []>} : vector<32x128xf32>, vector<128x128xf32>, vector<32x128xf32> -> vector<32x128xf32>
    %c0_38 = arith.constant 0 : index
    %c2_39 = arith.constant 2 : index
    %c0_40 = arith.constant 0 : index
    %37 = vector.load %arg11[%c0_38, %c2_39, %c0_40] : memref<2x20x128xf32, #tpu.memory_space<vmem>>, vector<2x16x128xf32>
    %38 = vector.shape_cast %37 : vector<2x16x128xf32> to vector<32x128xf32>
    %c1_41 = arith.constant 1 : index
    %c0_42 = arith.constant 0 : index
    %c0_43 = arith.constant 0 : index
    %39 = vector.load %arg5[%c1_41, %c0_42, %c0_43] : memref<3x128x128xf32, #tpu.memory_space<vmem>>, vector<1x128x128xf32>
    %40 = vector.shape_cast %39 : vector<1x128x128xf32> to vector<128x128xf32>
    %cst_44 = arith.constant dense<0.000000e+00> : vector<32x128xf32>
    %41 = tpu.matmul %38, %40, %cst_44 {dimension_numbers = #tpu.dot_dimension_numbers<[1], [0], [0], [1], [0, 0, 1, 1], [], []>} : vector<32x128xf32>, vector<128x128xf32>, vector<32x128xf32> -> vector<32x128xf32>
    %42 = arith.addf %36, %41 : vector<32x128xf32>
    %c0_45 = arith.constant 0 : index
    %c4_46 = arith.constant 4 : index
    %c0_47 = arith.constant 0 : index
    %43 = vector.load %arg11[%c0_45, %c4_46, %c0_47] : memref<2x20x128xf32, #tpu.memory_space<vmem>>, vector<2x16x128xf32>
    %44 = vector.shape_cast %43 : vector<2x16x128xf32> to vector<32x128xf32>
    %c2_48 = arith.constant 2 : index
    %c0_49 = arith.constant 0 : index
    %c0_50 = arith.constant 0 : index
    %45 = vector.load %arg5[%c2_48, %c0_49, %c0_50] : memref<3x128x128xf32, #tpu.memory_space<vmem>>, vector<1x128x128xf32>
    %46 = vector.shape_cast %45 : vector<1x128x128xf32> to vector<128x128xf32>
    %cst_51 = arith.constant dense<0.000000e+00> : vector<32x128xf32>
    %47 = tpu.matmul %44, %46, %cst_51 {dimension_numbers = #tpu.dot_dimension_numbers<[1], [0], [0], [1], [0, 0, 1, 1], [], []>} : vector<32x128xf32>, vector<128x128xf32>, vector<32x128xf32> -> vector<32x128xf32>
    %48 = arith.addf %42, %47 : vector<32x128xf32>
    %c0_52 = arith.constant 0 : index
    %c0_53 = arith.constant 0 : index
    %49 = vector.load %arg6[%c0_52, %c0_53] : memref<1x128xf32, #tpu.memory_space<vmem>>, vector<1x128xf32>
    %50 = vector.broadcast %49 : vector<1x128xf32> to vector<32x128xf32>
    %51 = arith.addf %48, %50 : vector<32x128xf32>
    %cst_54 = arith.constant 0.000000e+00 : f32
    %52 = vector.broadcast %cst_54 : f32 to vector<32x128xf32>
    %53 = arith.maximumf %51, %52 : vector<32x128xf32>
    %54 = vector.shape_cast %6 : vector<2x16x128xf32> to vector<32x128xf32>
    %c0_55 = arith.constant 0 : index
    %c0_56 = arith.constant 0 : index
    %c0_57 = arith.constant 0 : index
    %55 = vector.load %arg7[%c0_55, %c0_56, %c0_57] : memref<1x128x128xf32, #tpu.memory_space<vmem>>, vector<1x128x128xf32>
    %56 = vector.shape_cast %55 : vector<1x128x128xf32> to vector<128x128xf32>
    %cst_58 = arith.constant dense<0.000000e+00> : vector<32x128xf32>
    %57 = tpu.matmul %54, %56, %cst_58 {dimension_numbers = #tpu.dot_dimension_numbers<[1], [0], [0], [1], [0, 0, 1, 1], [], []>} : vector<32x128xf32>, vector<128x128xf32>, vector<32x128xf32> -> vector<32x128xf32>
    %c0_59 = arith.constant 0 : index
    %c0_60 = arith.constant 0 : index
    %58 = vector.load %arg8[%c0_59, %c0_60] : memref<1x128xf32, #tpu.memory_space<vmem>>, vector<1x128xf32>
    %59 = vector.broadcast %58 : vector<1x128xf32> to vector<32x128xf32>
    %60 = arith.addf %57, %59 : vector<32x128xf32>
    %61 = arith.addf %53, %60 : vector<32x128xf32>
    %cst_61 = arith.constant 0.000000e+00 : f32
    %62 = vector.broadcast %cst_61 : f32 to vector<32x128xf32>
    %63 = arith.maximumf %61, %62 : vector<32x128xf32>
    %64 = vector.shape_cast %63 : vector<32x128xf32> to vector<2x16x128xf32>
    %c0_62 = arith.constant 0 : index
    %c0_63 = arith.constant 0 : index
    %c0_64 = arith.constant 0 : index
    %65 = vector.load %arg9[%c0_62, %c0_63, %c0_64] : memref<2x16x128xf32, #tpu.memory_space<vmem>>, vector<2x16x128xf32>
    tpu.vector_store %arg9[%c0_62, %c0_63, %c0_64], %64 {strides = array<i32>} : memref<2x16x128xf32, #tpu.memory_space<vmem>>, vector<2x16x128xf32>,
    return
  }
  func.func @transform_0(%arg0: i32, %arg1: i32) -> (i32, i32, i32) {
    %c0_i32 = arith.constant 0 : i32
    %c0_i32_0 = arith.constant 0 : i32
    return %arg0, %arg1, %c0_i32 : i32, i32, i32
  }
  func.func @transform_1(%arg0: i32, %arg1: i32) -> (i32, i32, i32) {
    %c0_i32 = arith.constant 0 : i32
    %c0_i32_0 = arith.constant 0 : i32
    %c0_i32_1 = arith.constant 0 : i32
    %c0_i32_2 = arith.constant 0 : i32
    return %c0_i32, %c0_i32_0, %c0_i32_1 : i32, i32, i32
  }
  func.func @transform_2(%arg0: i32, %arg1: i32) -> (i32, i32) {
    %c0_i32 = arith.constant 0 : i32
    %c0_i32_0 = arith.constant 0 : i32
    %c0_i32_1 = arith.constant 0 : i32
    return %c0_i32, %c0_i32_0 : i32, i32
  }
  func.func @transform_3(%arg0: i32, %arg1: i32) -> (i32, i32, i32) {
    %c0_i32 = arith.constant 0 : i32
    %c0_i32_0 = arith.constant 0 : i32
    %c0_i32_1 = arith.constant 0 : i32
    %c0_i32_2 = arith.constant 0 : i32
    return %c0_i32, %c0_i32_0, %c0_i32_1 : i32, i32, i32
  }
  func.func @transform_4(%arg0: i32, %arg1: i32) -> (i32, i32) {
    %c0_i32 = arith.constant 0 : i32
    %c0_i32_0 = arith.constant 0 : i32
    %c0_i32_1 = arith.constant 0 : i32
    return %c0_i32, %c0_i32_0 : i32, i32
  }
  func.func @transform_5(%arg0: i32, %arg1: i32) -> (i32, i32, i32) {
    %c0_i32 = arith.constant 0 : i32
    %c0_i32_0 = arith.constant 0 : i32
    %c0_i32_1 = arith.constant 0 : i32
    %c0_i32_2 = arith.constant 0 : i32
    return %c0_i32, %c0_i32_0, %c0_i32_1 : i32, i32, i32
  }
  func.func @transform_6(%arg0: i32, %arg1: i32) -> (i32, i32) {
    %c0_i32 = arith.constant 0 : i32
    %c0_i32_0 = arith.constant 0 : i32
    %c0_i32_1 = arith.constant 0 : i32
    return %c0_i32, %c0_i32_0 : i32, i32
  }
  func.func @transform_7(%arg0: i32, %arg1: i32) -> (i32, i32, i32) {
    %c0_i32 = arith.constant 0 : i32
    %c0_i32_0 = arith.constant 0 : i32
    return %arg0, %arg1, %c0_i32 : i32, i32, i32
  }
}

module attributes {stable_mosaic.version = 11 : i64} {
  func.func @_temporal_block_kernel(%arg0: i32, %arg1: i32, %arg2: memref<2x16x128xf32, #tpu.memory_space<vmem>>, %arg3: memref<3x128x128xf32, #tpu.memory_space<vmem>>, %arg4: memref<1x128xf32, #tpu.memory_space<vmem>>, %arg5: memref<3x128x128xf32, #tpu.memory_space<vmem>>, %arg6: memref<1x128xf32, #tpu.memory_space<vmem>>, %arg7: memref<1x128x128xf32, #tpu.memory_space<vmem>>, %arg8: memref<1x128xf32, #tpu.memory_space<vmem>>, %arg9: memref<2x16x128xf32, #tpu.memory_space<vmem>>, %arg10: memref<2x20x128xf32, #tpu.memory_space<vmem>>, %arg11: memref<2x20x128xf32, #tpu.memory_space<vmem>>) attributes {dimension_semantics = [#tpu.dimension_semantics<parallel>, #tpu.dimension_semantics<arbitrary>], iteration_bounds = array<i64: 1, 3>, scalar_prefetch = 0 : i64, scratch_operands = 2 : i64, tpu.core_type = #tpu.core_type<tc>, window_params = [{transform_indices = @transform_0, window_bounds = array<i64: 2, 16, 128>}, {pipeline_mode = #tpu.pipeline_mode<synchronous>, transform_indices = @transform_1, window_bounds = array<i64: 3, 128, 128>}, {pipeline_mode = #tpu.pipeline_mode<synchronous>, transform_indices = @transform_2, window_bounds = array<i64: 1, 128>}, {pipeline_mode = #tpu.pipeline_mode<synchronous>, transform_indices = @transform_3, window_bounds = array<i64: 3, 128, 128>}, {pipeline_mode = #tpu.pipeline_mode<synchronous>, transform_indices = @transform_4, window_bounds = array<i64: 1, 128>}, {pipeline_mode = #tpu.pipeline_mode<synchronous>, transform_indices = @transform_5, window_bounds = array<i64: 1, 128, 128>}, {pipeline_mode = #tpu.pipeline_mode<synchronous>, transform_indices = @transform_6, window_bounds = array<i64: 1, 128>}, {transform_indices = @transform_7, window_bounds = array<i64: 2, 16, 128>}]} {
    %c0_i32 = arith.constant 0 : i32
    %0 = arith.cmpi eq, %arg1, %c0_i32 : i32
    %1 = arith.extui %0 : i1 to i32
    %c0_i32_0 = arith.constant 0 : i32
    %2 = arith.cmpi ne, %1, %c0_i32_0 : i32
    scf.if %2 {
      %cst_65 = arith.constant 0.000000e+00 : f32
      %66 = vector.broadcast %cst_65 : f32 to vector<2x4x128xf32>
      %c0_66 = arith.constant 0 : index
      %c0_67 = arith.constant 0 : index
      %c0_68 = arith.constant 0 : index
      %67 = vector.load %arg10[%c0_66, %c0_67, %c0_68] : memref<2x20x128xf32, #tpu.memory_space<vmem>>, vector<2x4x128xf32>
      tpu.vector_store %arg10[%c0_66, %c0_67, %c0_68], %66 {strides = array<i32>} : memref<2x20x128xf32, #tpu.memory_space<vmem>>, vector<2x4x128xf32>,
      %cst_69 = arith.constant 0.000000e+00 : f32
      %68 = vector.broadcast %cst_69 : f32 to vector<2x4x128xf32>
      %c0_70 = arith.constant 0 : index
      %c0_71 = arith.constant 0 : index
      %c0_72 = arith.constant 0 : index
      %69 = vector.load %arg11[%c0_70, %c0_71, %c0_72] : memref<2x20x128xf32, #tpu.memory_space<vmem>>, vector<2x4x128xf32>
      tpu.vector_store %arg11[%c0_70, %c0_71, %c0_72], %68 {strides = array<i32>} : memref<2x20x128xf32, #tpu.memory_space<vmem>>, vector<2x4x128xf32>,
    } else {
    }
    %c0_i32_1 = arith.constant 0 : i32
    %3 = arith.cmpi sgt, %arg1, %c0_i32_1 : i32
    %4 = arith.extui %3 : i1 to i32
    %c0_i32_2 = arith.constant 0 : i32
    %5 = arith.cmpi ne, %4, %c0_i32_2 : i32
    scf.if %5 {
      %c0_65 = arith.constant 0 : index
      %c16 = arith.constant 16 : index
      %c0_66 = arith.constant 0 : index
      %66 = vector.load %arg10[%c0_65, %c16, %c0_66] : memref<2x20x128xf32, #tpu.memory_space<vmem>>, vector<2x4x128xf32>
      %c0_67 = arith.constant 0 : index
      %c0_68 = arith.constant 0 : index
      %c0_69 = arith.constant 0 : index
      %67 = vector.load %arg10[%c0_67, %c0_68, %c0_69] : memref<2x20x128xf32, #tpu.memory_space<vmem>>, vector<2x4x128xf32>
      tpu.vector_store %arg10[%c0_67, %c0_68, %c0_69], %66 {strides = array<i32>} : memref<2x20x128xf32, #tpu.memory_space<vmem>>, vector<2x4x128xf32>,
      %c0_70 = arith.constant 0 : index
      %c16_71 = arith.constant 16 : index
      %c0_72 = arith.constant 0 : index
      %68 = vector.load %arg11[%c0_70, %c16_71, %c0_72] : memref<2x20x128xf32, #tpu.memory_space<vmem>>, vector<2x4x128xf32>
      %c0_73 = arith.constant 0 : index
      %c0_74 = arith.constant 0 : index
      %c0_75 = arith.constant 0 : index
      %69 = vector.load %arg11[%c0_73, %c0_74, %c0_75] : memref<2x20x128xf32, #tpu.memory_space<vmem>>, vector<2x4x128xf32>
      tpu.vector_store %arg11[%c0_73, %c0_74, %c0_75], %68 {strides = array<i32>} : memref<2x20x128xf32, #tpu.memory_space<vmem>>, vector<2x4x128xf32>,
    } else {
    }
    %c0 = arith.constant 0 : index
    %c0_3 = arith.constant 0 : index
    %c0_4 = arith.constant 0 : index
    %6 = vector.load %arg2[%c0, %c0_3, %c0_4] : memref<2x16x128xf32, #tpu.memory_space<vmem>>, vector<2x16x128xf32>
    %c0_5 = arith.constant 0 : index
    %c4 = arith.constant 4 : index
    %c0_6 = arith.constant 0 : index
    %7 = vector.load %arg10[%c0_5, %c4, %c0_6] : memref<2x20x128xf32, #tpu.memory_space<vmem>>, vector<2x16x128xf32>
    tpu.vector_store %arg10[%c0_5, %c4, %c0_6], %6 {strides = array<i32>} : memref<2x20x128xf32, #tpu.memory_space<vmem>>, vector<2x16x128xf32>,
    %c0_7 = arith.constant 0 : index
    %c0_8 = arith.constant 0 : index
    %c0_9 = arith.constant 0 : index
    %8 = vector.load %arg10[%c0_7, %c0_8, %c0_9] : memref<2x20x128xf32, #tpu.memory_space<vmem>>, vector<2x16x128xf32>
    %9 = vector.shape_cast %8 : vector<2x16x128xf32> to vector<32x128xf32>
    %c0_10 = arith.constant 0 : index
    %c0_11 = arith.constant 0 : index
    %c0_12 = arith.constant 0 : index
    %10 = vector.load %arg3[%c0_10, %c0_11, %c0_12] : memref<3x128x128xf32, #tpu.memory_space<vmem>>, vector<1x128x128xf32>
    %11 = vector.shape_cast %10 : vector<1x128x128xf32> to vector<128x128xf32>
    %cst = arith.constant dense<0.000000e+00> : vector<32x128xf32>
    %12 = tpu.matmul %9, %11, %cst {dimension_numbers = #tpu.dot_dimension_numbers<[1], [0], [0], [1], [0, 0, 1, 1], [], []>} : vector<32x128xf32>, vector<128x128xf32>, vector<32x128xf32> -> vector<32x128xf32>
    %c0_13 = arith.constant 0 : index
    %c2 = arith.constant 2 : index
    %c0_14 = arith.constant 0 : index
    %13 = vector.load %arg10[%c0_13, %c2, %c0_14] : memref<2x20x128xf32, #tpu.memory_space<vmem>>, vector<2x16x128xf32>
    %14 = vector.shape_cast %13 : vector<2x16x128xf32> to vector<32x128xf32>
    %c1 = arith.constant 1 : index
    %c0_15 = arith.constant 0 : index
    %c0_16 = arith.constant 0 : index
    %15 = vector.load %arg3[%c1, %c0_15, %c0_16] : memref<3x128x128xf32, #tpu.memory_space<vmem>>, vector<1x128x128xf32>
    %16 = vector.shape_cast %15 : vector<1x128x128xf32> to vector<128x128xf32>
    %cst_17 = arith.constant dense<0.000000e+00> : vector<32x128xf32>
    %17 = tpu.matmul %14, %16, %cst_17 {dimension_numbers = #tpu.dot_dimension_numbers<[1], [0], [0], [1], [0, 0, 1, 1], [], []>} : vector<32x128xf32>, vector<128x128xf32>, vector<32x128xf32> -> vector<32x128xf32>
    %18 = arith.addf %12, %17 : vector<32x128xf32>
    %c0_18 = arith.constant 0 : index
    %c4_19 = arith.constant 4 : index
    %c0_20 = arith.constant 0 : index
    %19 = vector.load %arg10[%c0_18, %c4_19, %c0_20] : memref<2x20x128xf32, #tpu.memory_space<vmem>>, vector<2x16x128xf32>
    %20 = vector.shape_cast %19 : vector<2x16x128xf32> to vector<32x128xf32>
    %c2_21 = arith.constant 2 : index
    %c0_22 = arith.constant 0 : index
    %c0_23 = arith.constant 0 : index
    %21 = vector.load %arg3[%c2_21, %c0_22, %c0_23] : memref<3x128x128xf32, #tpu.memory_space<vmem>>, vector<1x128x128xf32>
    %22 = vector.shape_cast %21 : vector<1x128x128xf32> to vector<128x128xf32>
    %cst_24 = arith.constant dense<0.000000e+00> : vector<32x128xf32>
    %23 = tpu.matmul %20, %22, %cst_24 {dimension_numbers = #tpu.dot_dimension_numbers<[1], [0], [0], [1], [0, 0, 1, 1], [], []>} : vector<32x128xf32>, vector<128x128xf32>, vector<32x128xf32> -> vector<32x128xf32>
    %24 = arith.addf %18, %23 : vector<32x128xf32>
    %c0_25 = arith.constant 0 : index
    %c0_26 = arith.constant 0 : index
    %25 = vector.load %arg4[%c0_25, %c0_26] : memref<1x128xf32, #tpu.memory_space<vmem>>, vector<1x128xf32>
    %26 = vector.broadcast %25 : vector<1x128xf32> to vector<32x128xf32>
    %27 = arith.addf %24, %26 : vector<32x128xf32>
    %cst_27 = arith.constant 0.000000e+00 : f32
    %28 = vector.broadcast %cst_27 : f32 to vector<32x128xf32>
    %29 = arith.maximumf %27, %28 : vector<32x128xf32>
    %30 = vector.shape_cast %29 : vector<32x128xf32> to vector<2x16x128xf32>
    %c0_28 = arith.constant 0 : index
    %c4_29 = arith.constant 4 : index
    %c0_30 = arith.constant 0 : index
    %31 = vector.load %arg11[%c0_28, %c4_29, %c0_30] : memref<2x20x128xf32, #tpu.memory_space<vmem>>, vector<2x16x128xf32>
    tpu.vector_store %arg11[%c0_28, %c4_29, %c0_30], %30 {strides = array<i32>} : memref<2x20x128xf32, #tpu.memory_space<vmem>>, vector<2x16x128xf32>,
    %c0_31 = arith.constant 0 : index
    %c0_32 = arith.constant 0 : index
    %c0_33 = arith.constant 0 : index
    %32 = vector.load %arg11[%c0_31, %c0_32, %c0_33] : memref<2x20x128xf32, #tpu.memory_space<vmem>>, vector<2x16x128xf32>
    %33 = vector.shape_cast %32 : vector<2x16x128xf32> to vector<32x128xf32>
    %c0_34 = arith.constant 0 : index
    %c0_35 = arith.constant 0 : index
    %c0_36 = arith.constant 0 : index
    %34 = vector.load %arg5[%c0_34, %c0_35, %c0_36] : memref<3x128x128xf32, #tpu.memory_space<vmem>>, vector<1x128x128xf32>
    %35 = vector.shape_cast %34 : vector<1x128x128xf32> to vector<128x128xf32>
    %cst_37 = arith.constant dense<0.000000e+00> : vector<32x128xf32>
    %36 = tpu.matmul %33, %35, %cst_37 {dimension_numbers = #tpu.dot_dimension_numbers<[1], [0], [0], [1], [0, 0, 1, 1], [], []>} : vector<32x128xf32>, vector<128x128xf32>, vector<32x128xf32> -> vector<32x128xf32>
    %c0_38 = arith.constant 0 : index
    %c2_39 = arith.constant 2 : index
    %c0_40 = arith.constant 0 : index
    %37 = vector.load %arg11[%c0_38, %c2_39, %c0_40] : memref<2x20x128xf32, #tpu.memory_space<vmem>>, vector<2x16x128xf32>
    %38 = vector.shape_cast %37 : vector<2x16x128xf32> to vector<32x128xf32>
    %c1_41 = arith.constant 1 : index
    %c0_42 = arith.constant 0 : index
    %c0_43 = arith.constant 0 : index
    %39 = vector.load %arg5[%c1_41, %c0_42, %c0_43] : memref<3x128x128xf32, #tpu.memory_space<vmem>>, vector<1x128x128xf32>
    %40 = vector.shape_cast %39 : vector<1x128x128xf32> to vector<128x128xf32>
    %cst_44 = arith.constant dense<0.000000e+00> : vector<32x128xf32>
    %41 = tpu.matmul %38, %40, %cst_44 {dimension_numbers = #tpu.dot_dimension_numbers<[1], [0], [0], [1], [0, 0, 1, 1], [], []>} : vector<32x128xf32>, vector<128x128xf32>, vector<32x128xf32> -> vector<32x128xf32>
    %42 = arith.addf %36, %41 : vector<32x128xf32>
    %c0_45 = arith.constant 0 : index
    %c4_46 = arith.constant 4 : index
    %c0_47 = arith.constant 0 : index
    %43 = vector.load %arg11[%c0_45, %c4_46, %c0_47] : memref<2x20x128xf32, #tpu.memory_space<vmem>>, vector<2x16x128xf32>
    %44 = vector.shape_cast %43 : vector<2x16x128xf32> to vector<32x128xf32>
    %c2_48 = arith.constant 2 : index
    %c0_49 = arith.constant 0 : index
    %c0_50 = arith.constant 0 : index
    %45 = vector.load %arg5[%c2_48, %c0_49, %c0_50] : memref<3x128x128xf32, #tpu.memory_space<vmem>>, vector<1x128x128xf32>
    %46 = vector.shape_cast %45 : vector<1x128x128xf32> to vector<128x128xf32>
    %cst_51 = arith.constant dense<0.000000e+00> : vector<32x128xf32>
    %47 = tpu.matmul %44, %46, %cst_51 {dimension_numbers = #tpu.dot_dimension_numbers<[1], [0], [0], [1], [0, 0, 1, 1], [], []>} : vector<32x128xf32>, vector<128x128xf32>, vector<32x128xf32> -> vector<32x128xf32>
    %48 = arith.addf %42, %47 : vector<32x128xf32>
    %c0_52 = arith.constant 0 : index
    %c0_53 = arith.constant 0 : index
    %49 = vector.load %arg6[%c0_52, %c0_53] : memref<1x128xf32, #tpu.memory_space<vmem>>, vector<1x128xf32>
    %50 = vector.broadcast %49 : vector<1x128xf32> to vector<32x128xf32>
    %51 = arith.addf %48, %50 : vector<32x128xf32>
    %cst_54 = arith.constant 0.000000e+00 : f32
    %52 = vector.broadcast %cst_54 : f32 to vector<32x128xf32>
    %53 = arith.maximumf %51, %52 : vector<32x128xf32>
    %54 = vector.shape_cast %6 : vector<2x16x128xf32> to vector<32x128xf32>
    %c0_55 = arith.constant 0 : index
    %c0_56 = arith.constant 0 : index
    %c0_57 = arith.constant 0 : index
    %55 = vector.load %arg7[%c0_55, %c0_56, %c0_57] : memref<1x128x128xf32, #tpu.memory_space<vmem>>, vector<1x128x128xf32>
    %56 = vector.shape_cast %55 : vector<1x128x128xf32> to vector<128x128xf32>
    %cst_58 = arith.constant dense<0.000000e+00> : vector<32x128xf32>
    %57 = tpu.matmul %54, %56, %cst_58 {dimension_numbers = #tpu.dot_dimension_numbers<[1], [0], [0], [1], [0, 0, 1, 1], [], []>} : vector<32x128xf32>, vector<128x128xf32>, vector<32x128xf32> -> vector<32x128xf32>
    %c0_59 = arith.constant 0 : index
    %c0_60 = arith.constant 0 : index
    %58 = vector.load %arg8[%c0_59, %c0_60] : memref<1x128xf32, #tpu.memory_space<vmem>>, vector<1x128xf32>
    %59 = vector.broadcast %58 : vector<1x128xf32> to vector<32x128xf32>
    %60 = arith.addf %57, %59 : vector<32x128xf32>
    %61 = arith.addf %53, %60 : vector<32x128xf32>
    %cst_61 = arith.constant 0.000000e+00 : f32
    %62 = vector.broadcast %cst_61 : f32 to vector<32x128xf32>
    %63 = arith.maximumf %61, %62 : vector<32x128xf32>
    %64 = vector.shape_cast %63 : vector<32x128xf32> to vector<2x16x128xf32>
    %c0_62 = arith.constant 0 : index
    %c0_63 = arith.constant 0 : index
    %c0_64 = arith.constant 0 : index
    %65 = vector.load %arg9[%c0_62, %c0_63, %c0_64] : memref<2x16x128xf32, #tpu.memory_space<vmem>>, vector<2x16x128xf32>
    tpu.vector_store %arg9[%c0_62, %c0_63, %c0_64], %64 {strides = array<i32>} : memref<2x16x128xf32, #tpu.memory_space<vmem>>, vector<2x16x128xf32>,
    return
  }
  func.func @transform_0(%arg0: i32, %arg1: i32) -> (i32, i32, i32) {
    %c0_i32 = arith.constant 0 : i32
    %c0_i32_0 = arith.constant 0 : i32
    return %arg0, %arg1, %c0_i32 : i32, i32, i32
  }
  func.func @transform_1(%arg0: i32, %arg1: i32) -> (i32, i32, i32) {
    %c0_i32 = arith.constant 0 : i32
    %c0_i32_0 = arith.constant 0 : i32
    %c0_i32_1 = arith.constant 0 : i32
    %c0_i32_2 = arith.constant 0 : i32
    return %c0_i32, %c0_i32_0, %c0_i32_1 : i32, i32, i32
  }
  func.func @transform_2(%arg0: i32, %arg1: i32) -> (i32, i32) {
    %c0_i32 = arith.constant 0 : i32
    %c0_i32_0 = arith.constant 0 : i32
    %c0_i32_1 = arith.constant 0 : i32
    return %c0_i32, %c0_i32_0 : i32, i32
  }
  func.func @transform_3(%arg0: i32, %arg1: i32) -> (i32, i32, i32) {
    %c0_i32 = arith.constant 0 : i32
    %c0_i32_0 = arith.constant 0 : i32
    %c0_i32_1 = arith.constant 0 : i32
    %c0_i32_2 = arith.constant 0 : i32
    return %c0_i32, %c0_i32_0, %c0_i32_1 : i32, i32, i32
  }
  func.func @transform_4(%arg0: i32, %arg1: i32) -> (i32, i32) {
    %c0_i32 = arith.constant 0 : i32
    %c0_i32_0 = arith.constant 0 : i32
    %c0_i32_1 = arith.constant 0 : i32
    return %c0_i32, %c0_i32_0 : i32, i32
  }
  func.func @transform_5(%arg0: i32, %arg1: i32) -> (i32, i32, i32) {
    %c0_i32 = arith.constant 0 : i32
    %c0_i32_0 = arith.constant 0 : i32
    %c0_i32_1 = arith.constant 0 : i32
    %c0_i32_2 = arith.constant 0 : i32
    return %c0_i32, %c0_i32_0, %c0_i32_1 : i32, i32, i32
  }
  func.func @transform_6(%arg0: i32, %arg1: i32) -> (i32, i32) {
    %c0_i32 = arith.constant 0 : i32
    %c0_i32_0 = arith.constant 0 : i32
    %c0_i32_1 = arith.constant 0 : i32
    return %c0_i32, %c0_i32_0 : i32, i32
  }
  func.func @transform_7(%arg0: i32, %arg1: i32) -> (i32, i32, i32) {
    %c0_i32 = arith.constant 0 : i32
    %c0_i32_0 = arith.constant 0 : i32
    return %arg0, %arg1, %c0_i32 : i32, i32, i32
  }
}

</mosaic_0001>

<bundles_post_ra>
// kernel: tpu_custom_call.1
= control target key start
LH: loop header
LB: loop body
LE: loop exit
PB: predicated region body
PF: predicated region fallthrough
CT: control target
= control target key end

     0   :  { %s2484_s0 = inlined_call_operand.hbm [shape: f32[2,48,128], index: 0, kind: input, shape index: {}]   ;;  %s2485_s1 = inlined_call_operand.hbm [shape: f32[3,128,128], index: 1, kind: input, shape index: {}]   ;;  %s2486_s2 = inlined_call_operand.vmem [shape: f32[1,128], index: 2, kind: input, shape index: {}]   ;;  %s2487_s3 = inlined_call_operand.hbm [shape: f32[3,128,128], index: 3, kind: input, shape index: {}]   ;;  %s2488_s4 = inlined_call_operand.vmem [shape: f32[1,128], index: 4, kind: input, shape index: {}]   ;;  %s2489_s5 = inlined_call_operand.hbm [shape: f32[1,128,128], index: 5, kind: input, shape index: {}]   ;;  %s2490_s6 = inlined_call_operand.vmem [shape: f32[1,128], index: 6, kind: input, shape index: {}]   ;;  %s2491_s7 = inlined_call_operand.hbm [shape: f32[2,48,128], index: 7, kind: output, shape index: {}]  }
   0x1   :  { %2494 = sst [smem:[#allocation24_spill]] %s2485_s1 }
   0x2   :  { %2495 = sst [smem:[#allocation25_spill]] %s2487_s3 }
   0x3   :  { %2496 = sst [smem:[#allocation26_spill]] %s2489_s5 }
   0x4   :  { %12 = vsyncpa [#allocation5], 0 }
   0x5   :  { %14 = vsyncpa [#allocation5 + $0x1], 0 }
   0x6   :  { %15 = vsyncpa [#allocation8], 0 }
   0x7   :  { %16 = vsyncpa [#allocation11], 0 }
   0x8   :  { %17 = vsyncpa [#allocation6], 0 }
   0x9   :  { %19 = vsyncpa [#allocation6 + $0x1], 0  ;;  %s2155_s24 = smov 0   ;;  %s2157_s25 = smov 0  }
   0xa   :  { %s2159_s26 = smov 0   ;;  %s2161_s27 = smov 0  }
   0xb   :  { %s2163_s28 = smov 0   ;;  %s2165_s29 = smov 0  }
   0xc LB: > { %s1369_s30 = sadd.s32 4294967295, %s2094_s29   ;;  %s1370_s8 = sadd.s32 4294967294, %s2094_s29   ;;  %s2094_s29 = sphi %s2165_s29, %s25_s29   ;;  %s2090_s28 = sphi %s2163_s28, %s2517_s28   ;;  %s2086_s27 = sphi %s2161_s27, %s2516_s27   ;;  %s2082_s26 = sphi %s2159_s26, %s2515_s26   ;;  %s2078_s25 = sphi %s2157_s25, %s2514_s25   ;;  %s2074_s24 = sphi %s2155_s24, %s2513_s24  }
   0xd   : > { %s34_s9 = sadd.s32 1, %s2090_s28  ;;  %s46_s10 = sadd.s32 1, %s2082_s26 }
   0xe   : > { %p35_p0 = scmp.ge.s32.totalorder %s34_s9, 3  ;;  %p53_p1 = scmp.ne.s32.totalorder %s2082_s26, %s2078_s25 }
   0xf   : > { %p54_p2 = scmp.eq.s32.totalorder %s2094_s29, 0  ;;  %p59_p3 = scmp.ne.s32.totalorder %s2078_s25, %s2074_s24 }
  0x10   : > { %s2519_s9 = smov (%p35_p0, %s34_s9), 0  ;;  %p2200_p5 = scmp.eq.s32.totalorder %s1369_s30, 0 }
  0x11   : > { %2497 = sst [smem:[#allocation22_spill]] %s2519_s9  ;;  %p2196_p4 = por %p54_p2, %p53_p1 }
  0x12   : > { %s42_s13 = ssub.s32 %s2090_s28, %s2519_s9  ;;  %p211_p6 = scmp.eq.s32.totalorder %s1369_s30, 2 }
  0x13   : > { %p44_p7 = scmp.eq.s32.totalorder %s42_s13, 0  ;;  %p2208_p8 = por %p2200_p5, %p59_p3 }
  0x14   : > { %p2212_p9 = por %p211_p6, %p53_p1  ;;  %p217_p10 = scmp.eq.s32.totalorder %s1370_s8, 2 }
  0x15   : > { %s2217_s16 = scalar_select %p44_p7, %s2082_s26, %s46_s10  }
  0x16   : > { %s2501_s15 = scalar_select %p2212_p9, 1, 0 }
  0x17   : > { %2502 = sst [smem:[#allocation23_spill]] %s2217_s16  ;;  %p2219_p11 = por %p217_p10, %p59_p3 }
  0x18   : > { %p1371_p12 = scmp.ge.s32.totalorder %s2094_s29, 1  ;;  %p224_p13 = scmp.lt.s32.totalorder %s2094_s29, 4 }
  0x19   : > { %s2503_s17 = scalar_select %p2219_p11, 1, 0 }
  0x1a   : > { %p2225_p0 = pnand %p1371_p12, %p224_p13  ;;  %s2096_s19 = smov [#allocation7]  }
  0x1b   : > { %s236_s20 = sshll.u32 %s2096_s19, 4  ;;  %s2097_s21 = smov [#allocation9]   ;;  %s237_s20 = int_to_ptr.vmem [resolvable:$true] %s236_s20 }
  0x1c   : > { %p1866_p1 = pneg %p2225_p0  ;;  %s252_s22 = sshll.u32 %s2097_s21, 4  ;;  %s2237_s22 = int_to_ptr.vmem [resolvable:$true] %s252_s22 }
  0x1d   : > { %s2098_s30 = smov [#allocation10]   ;;  %s1965_s10 = scalar_lea.vmem %s237_s20, 6144 }
  0x1e   : > { %p2233_p2 = pnand %p1866_p1, %p2200_p5  ;;  %s268_s8 = sshll.u32 %s2098_s30, 4  ;;  %s2239_s8 = int_to_ptr.vmem [resolvable:$true] %s268_s8 }
  0x1f   : > { %p1966_p6 = scmp.ne.s32.totalorder %s237_s20, %s1965_s10  ;;  %p1973_p12 = scmp.lt.s32.totalorder %s237_s20, %s237_s20 }
  0x20   : > { %p1956_p3 = pneg %p2233_p2  ;;  %p1974_p13 = scmp.lt.s32.totalorder %s1965_s10, %s1965_s10 }
  0x22   : > { %p1968_p7 = pnand %p1966_p6, %p1956_p3  ;;  %p1975_p1 = por %p1974_p13, %p1973_p12 }
  0x24   : > { %p1969_p10 = pneg %p1968_p7 }
  0x26   : > { %p1976_p11 = pnand %p1975_p1, %p1969_p10 }
  0x28   : > { %1979 = shalt.err (!%p1976_p11)
}
  0x29   : > { %s2099_s13 = smov 128   ;;  %s2100_s19 = smov 8  }
  0x2a   : > { %s2506_s1 = sld [smem:[#allocation24_spill]]  ;;  %s1991_s9 = scalar_lea.vmem %s2237_s22, 6144 }
  0x2b   : > { %p1992_p6 = scmp.ne.s32.totalorder %s2237_s22, %s1991_s9  ;;  %p1999_p11 = scmp.lt.s32.totalorder %s2237_s22, %s2237_s22 }
  0x2c   : > { %p2000_p10 = scmp.lt.s32.totalorder %s1991_s9, %s1991_s9 }
  0x2d   : > { %p1994_p7 = pnand %p1992_p6, %p1956_p3 }
  0x2e   : > { %p2001_p13 = por %p2000_p10, %p1999_p11 }
  0x2f   : > { %p1995_p12 = pneg %p1994_p7 }
  0x30   : > { %1869 = dma.hbm_to_vmem [thread:$0]  (!%p2233_p2), %s2506_s1, 6144, %s237_s20, [#allocation8], %s2099_s13, %s2099_s13, %s2100_s19  }
  0x31   : > { %p2002_p1 = pnand %p2001_p13, %p1995_p12 }
  0x33   : > { %2005 = shalt.err (!%p2002_p1)
}
  0x34   : > { %s2507_s3 = sld [smem:[#allocation25_spill]]  ;;  %s2017_s20 = scalar_lea.vmem %s2239_s8, 2048 }
  0x35   : > { %p2018_p6 = scmp.ne.s32.totalorder %s2239_s8, %s2017_s20  ;;  %p2025_p12 = scmp.lt.s32.totalorder %s2239_s8, %s2239_s8 }
  0x36   : > { %p2026_p11 = scmp.lt.s32.totalorder %s2017_s20, %s2017_s20 }
  0x37   : > { %p2020_p7 = pnand %p2018_p6, %p1956_p3 }
  0x38   : > { %p2027_p10 = por %p2026_p11, %p2025_p12 }
  0x39   : > { %p2021_p9 = pneg %p2020_p7 }
  0x3a   : > { %1872 = dma.hbm_to_vmem [thread:$0]  (!%p2233_p2), %s2507_s3, 6144, %s2237_s22, [#allocation8], %s2099_s13, %s2099_s13, %s2100_s19  }
  0x3b   : > { %p2028_p13 = pnand %p2027_p10, %p2021_p9 }
  0x3d   : > { %2031 = shalt.err (!%p2028_p13)
}
  0x3e   : > { %s2508_s5 = sld [smem:[#allocation26_spill]]  ;;  %p1375_p1 = scmp.ge.s32.totalorder %s2094_s29, 3 }
  0x40   : > { %281 = sbr.rel (%p1375_p1) target bundleno = 82 (0x52), region = 40 }
  0x44   : > { %1875 = dma.hbm_to_vmem [thread:$0]  (!%p2233_p2), %s2508_s5, 2048, %s2239_s8, [#allocation11], %s2099_s13, %s2099_s13, %s2100_s19  }
  0x45   : > { %s285_s22 = sand.u32 1, %s2082_s26   ;;  %s1397_s21 = sshll.u32 %s2090_s28, 8 }
  0x46   : > { %s1376_s30 = sshll.u32 %s285_s22, 5  ;;  %s298_s20 = scalar_lea.hbm %s2484_s0, %s1397_s21 }
  0x47   : > { %s1843_s8 = scalar_select %p2196_p4, [#allocation0], [#allocation17] }
  0x48   : > { %s289_s13 = scalar_lea.vmem [#allocation4], %s1376_s30  ;;  %s2101_s16 = smov 768  }
  0x49   : > { %s311_s19 = sshll.u32 %s289_s13, 4  ;;  %s303_s9 = sld [smem:[%s1843_s8]]   ;;  %s312_s19 = int_to_ptr.vmem [resolvable:$true] %s311_s19 }
  0x4a   : > { %1844 = sst [smem:[#allocation14]] (%p2196_p4), %s2101_s16  ;;  %s2102_s1 = smov 256  }
  0x4b   : > { %1845 = sst [smem:[#allocation14 + $0x1]] (%p2196_p4), %s2102_s1  ;;  %s2103_s3 = smov 2  }
  0x4c   : > { %1846 = sst [smem:[#allocation14 + $0x2]] (%p2196_p4), %s2103_s3  ;;  %s2104_s5 = smov 128  }
  0x4d   : > { %1847 = sst [smem:[#allocation14 + $0x3]] (%p2196_p4), %s2104_s5  ;;  %s2105_s30 = smov 8  }
  0x4e   : > { %1848 = sst [smem:[#allocation14 + $0x4]] (%p2196_p4), %s2104_s5  ;;  %s286_s10 = scalar_lea.sflag [#allocation5], %s285_s22 }
  0x4f   : > { %s1379_s21 = sshll.u32 %s303_s9, 26  ;;  %1849 = sst [smem:[#allocation14 + $0x5]] (%p2196_p4), %s2105_s30 }
  0x50   : > { %s1380_s23 = sadd.s32 134217728, %s1379_s21  ;;  %s2106_s8 = smov 131072  }
  0x51   : > { %1850 = dma.general (%p2196_p4), %s298_s20, 512, %s312_s19, %s286_s10, %s2106_s8, [#allocation14], %s1380_s23, 0  }
  0x52 PF: > { %336 = sbr.rel (%p2225_p0) target bundleno = 670 (0x29e), region = 48  ;;  %s2302_s1 = sand.u32 (!%p2225_p0), 1, %s2078_s25  }
  0x53   : > { %s1382_s3 = sshll.u32 (!%p2225_p0), %s2302_s1, 5  ;;  %s339_s5 = scalar_lea.sflag (!%p2225_p0), [#allocation5], %s2302_s1 }
  0x54   : > { %s2306_s13 = scalar_lea.vmem (!%p2225_p0), [#allocation4], %s1382_s3 }
  0x57   : > { %2057 = dma.done.wait (%p2208_p8), %s339_s5, 512  }
  0x58   : > { %2059 = vsyncadd (%p2208_p8), %s339_s5, 4294966784 }
  0x59   : > { %2061 = dma.done.wait (%p2200_p5), [#allocation8], 12288  }
  0x5a   : > { %2063 = vsyncadd (%p2200_p5), [#allocation8], 4294955008 }
  0x5b   : > { %2065 = dma.done.wait (%p2200_p5), [#allocation11], 2048  }
  0x5c   : > { %2067 = vsyncadd (%p2200_p5), [#allocation11], 4294965248  ;;  %s2320_s11 = scalar_lea.vmem [#allocation12], %s1382_s3  ;;  %p1387_p4 = scmp.ne.s32.totalorder %s2086_s27, 0 }
  0x5e   : > { %392 = sbr.rel (%p1387_p4) target bundleno = 102 (0x66), region = 68 }
  0x63   : > { %v2107_v0 = vmov 0.0  }
  0x64   : > { %393 = vst [vmem:[#allocation2] sm:$0xf] %v2107_v0  ;;  %394 = vst [vmem:[#allocation2 + $0x18] sm:$0xf] %v2107_v0 }
  0x65   : > { %395 = vst [vmem:[#allocation3] sm:$0xf] %v2107_v0  ;;  %396 = vst [vmem:[#allocation3 + $0x18] sm:$0xf] %v2107_v0 }
  0x66 PF: > { %p1388_p8 = scmp.le.s32.totalorder %s2086_s27, 0 }
  0x68   : > { %400 = sbr.rel (%p1388_p8) target bundleno = 112 (0x70), region = 72 }
  0x6d   : > { %v401_v1 = vld [vmem:[#allocation2 + $0x10] sm:$0xf]  ;;  %v402_v2 = vld [vmem:[#allocation2 + $0x28] sm:$0xf]  ;;  %v405_v3 = vld [vmem:[#allocation3 + $0x10] sm:$0xf] }
  0x6e   : > { %403 = vst [vmem:[#allocation2] sm:$0xf] %v401_v1  ;;  %404 = vst [vmem:[#allocation2 + $0x18] sm:$0xf] %v402_v2  ;;  %v406_v4 = vld [vmem:[#allocation3 + $0x28] sm:$0xf] }
  0x6f   : > { %407 = vst [vmem:[#allocation3] sm:$0xf] %v405_v3  ;;  %408 = vst [vmem:[#allocation3 + $0x18] sm:$0xf] %v406_v4 }
  0x70 PF: > { %v457_v5 = vld [vmem:[#allocation7 + $0xf8] sm:$0xff]  ;;  %v456_v7 = vld [vmem:[#allocation7 + $0xf0] sm:$0xff]  ;;  %v455_v9 = vld [vmem:[#allocation7 + $0xe8] sm:$0xff]  ;;  %s1214_s9 = scalar_lea.sflag [#allocation6], %s2302_s1 }
  0x71   : > { %v436_v6 = vld [vmem:[#allocation7 + $0x78] sm:$0xff]  ;;  %1539 = vmatprep.subr.mxu0 %v457_v5  ;;  %v435_v8 = vld [vmem:[#allocation7 + $0x70] sm:$0xff]  ;;  %v434_v10 = vld [vmem:[#allocation7 + $0x68] sm:$0xff] }
  0x72   : > { %1577 = vmatprep.subr.mxu1 %v436_v6  ;;  %1540 = vmatpush3.msra.mxu0 %v457_v5  ;;  %v454_v11 = vld [vmem:[#allocation7 + $0xe0] sm:$0xff]  ;;  %v453_v13 = vld [vmem:[#allocation7 + $0xd8] sm:$0xff]  ;;  %v452_v15 = vld [vmem:[#allocation7 + $0xd0] sm:$0xff] }
  0x73   : > { %1578 = vmatpush3.msra.mxu1 %v436_v6  ;;  %1541 = vmatprep.subr.mxu0 %v456_v7  ;;  %v433_v12 = vld [vmem:[#allocation7 + $0x60] sm:$0xff]  ;;  %v432_v14 = vld [vmem:[#allocation7 + $0x58] sm:$0xff]  ;;  %v431_v16 = vld [vmem:[#allocation7 + $0x50] sm:$0xff] }
  0x74   : > { %1579 = vmatprep.subr.mxu1 %v435_v8  ;;  %1542 = vmatpush3.msra.mxu0 %v456_v7  ;;  %v451_v17 = vld [vmem:[#allocation7 + $0xc8] sm:$0xff]  ;;  %v2325_v19 = vld [vmem:[%s2306_s13] sm:$0xff]  ;;  %v449_v23 = vld [vmem:[#allocation7 + $0xb8] sm:$0xff] }
  0x75   : > { %1580 = vmatpush3.msra.mxu1 %v435_v8  ;;  %1543 = vmatprep.subr.mxu0 %v455_v9  ;;  %v430_v18 = vld [vmem:[#allocation7 + $0x48] sm:$0xff]  ;;  %413 = vst [vmem:[#allocation2 + $0x4] sm:$0xff] %v2325_v19  ;;  %v450_v21 = vld [vmem:[#allocation7 + $0xc0] sm:$0xff]  ;;  %v428_v24 = vld [vmem:[#allocation7 + $0x38] sm:$0xff] }
  0x76   : > { %1581 = vmatprep.subr.mxu1 %v434_v10  ;;  %1544 = vmatpush3.msra.mxu0 %v455_v9  ;;  %v2329_v20 = vld [vmem:[%s2306_s13 + $0x8] sm:$0xff]  ;;  %v429_v22 = vld [vmem:[#allocation7 + $0x40] sm:$0xff]  ;;  %v2333_v25 = vld [vmem:[%s2306_s13 + $0x10] sm:$0xff] }
  0x77   : > { %1582 = vmatpush3.msra.mxu1 %v434_v10  ;;  %1545 = vmatprep.subr.mxu0 %v454_v11  ;;  %414 = vst [vmem:[#allocation2 + $0xc] sm:$0xff] %v2329_v20  ;;  %v448_v26 = vld [vmem:[#allocation7 + $0xb0] sm:$0xff]  ;;  %415 = vst [vmem:[#allocation2 + $0x1c] sm:$0xff] %v2333_v25  ;;  %v2337_v28 = vld [vmem:[%s2306_s13 + $0x18] sm:$0xff] }
  0x78   : > { %1583 = vmatprep.subr.mxu1 %v433_v12  ;;  %1546 = vmatpush3.msra.mxu0 %v454_v11  ;;  %v427_v27 = vld [vmem:[#allocation7 + $0x30] sm:$0xff]  ;;  %416 = vst [vmem:[#allocation2 + $0x24] sm:$0xff] %v2337_v28  ;;  %v447_v29 = vld [vmem:[#allocation7 + $0xa8] sm:$0xff]  ;;  %v446_v31 = vld [vmem:[#allocation7 + $0xa0] sm:$0xff] }
  0x79   : > { %1584 = vmatpush3.msra.mxu1 %v433_v12  ;;  %1547 = vmatprep.subr.mxu0 %v453_v13  ;;  %v426_v30 = vld [vmem:[#allocation7 + $0x28] sm:$0xff]  ;;  %v425_v32 = vld [vmem:[#allocation7 + $0x20] sm:$0xff]  ;;  %v445_v33 = vld [vmem:[#allocation7 + $0x98] sm:$0xff] }
  0x7a   : > { %1585 = vmatprep.subr.mxu1 %v432_v14  ;;  %1548 = vmatpush3.msra.mxu0 %v453_v13  ;;  %v424_v34 = vld [vmem:[#allocation7 + $0x18] sm:$0xff]  ;;  %v444_v35 = vld [vmem:[#allocation7 + $0x90] sm:$0xff]  ;;  %v443_v37 = vld [vmem:[#allocation7 + $0x88] sm:$0xff] }
  0x7b   : > { %1586 = vmatpush3.msra.mxu1 %v432_v14  ;;  %1549 = vmatprep.subr.mxu0 %v452_v15  ;;  %v423_v36 = vld [vmem:[#allocation7 + $0x10] sm:$0xff]  ;;  %v422_v38 = vld [vmem:[#allocation7 + $0x8] sm:$0xff]  ;;  %v442_v39 = vld [vmem:[#allocation7 + $0x80] sm:$0xff] }
  0x7c   : > { %1587 = vmatprep.subr.mxu1 %v431_v16  ;;  %1550 = vmatpush3.msra.mxu0 %v452_v15  ;;  %v421_v40 = vld [vmem:[#allocation7] sm:$0xff]  ;;  %v648_v45 = vld [vmem:[#allocation7 + $0x178] sm:$0xff]  ;;  %v647_v48 = vld [vmem:[#allocation7 + $0x170] sm:$0xff] }
  0x7d   : > { %1588 = vmatpush3.msra.mxu1 %v431_v16  ;;  %1551 = vmatprep.subr.mxu0 %v451_v17  ;;  %v437_v41 = vld [vmem:[#allocation2 + $0x2] sm:$0xff]  ;;  %v644_v53 = vld [vmem:[#allocation7 + $0x158] sm:$0xff]  ;;  %v643_v54 = vld [vmem:[#allocation7 + $0x150] sm:$0xff] }
  0x7e   : > { %1589 = vmatprep.subr.mxu1 %v430_v18  ;;  %1552 = vmatpush3.msra.mxu0 %v451_v17  ;;  %v417_v42 = vld [vmem:[#allocation2] sm:$0xff]  ;;  %v438_v43 = vld [vmem:[#allocation2 + $0xa] sm:$0xff]  ;;  %v419_v47 = vld [vmem:[#allocation2 + $0x18] sm:$0xff] }
  0x7f   : > { %1590 = vmatpush3.msra.mxu1 %v430_v18  ;;  %1553 = vmatprep.subr.mxu0 %v450_v21  ;;  %v418_v44 = vld [vmem:[#allocation2 + $0x8] sm:$0xff]  ;;  %v439_v46 = vld [vmem:[#allocation2 + $0x1a] sm:$0xff]  ;;  %v639_v58 = vld [vmem:[#allocation7 + $0x130] sm:$0xff] }
  0x80   : > { %1591 = vmatprep.subr.mxu1 %v429_v22  ;;  %1554 = vmatpush3.msra.mxu0 %v450_v21  ;;  %v420_v49 = vld [vmem:[#allocation2 + $0x20] sm:$0xff]  ;;  %v646_v50 = vld [vmem:[#allocation7 + $0x168] sm:$0xff]  ;;  %v640_v57 = vld [vmem:[#allocation7 + $0x138] sm:$0xff] }
  0x81   : > { %1592 = vmatpush3.msra.mxu1 %v429_v22  ;;  %1555 = vmatprep.subr.mxu0 %v449_v23  ;;  %v440_v51 = vld [vmem:[#allocation2 + $0x22] sm:$0xff]  ;;  %v636_v61 = vld [vmem:[#allocation7 + $0x118] sm:$0xff]  ;;  %v635_v62 = vld [vmem:[#allocation7 + $0x110] sm:$0xff] }
  0x82   : > { %1593 = vmatprep.subr.mxu1 %v428_v24  ;;  %1556 = vmatpush3.msra.mxu0 %v449_v23  ;;  %v645_v52 = vld [vmem:[#allocation7 + $0x160] sm:$0xff]  ;;  %v642_v55 = vld [vmem:[#allocation7 + $0x148] sm:$0xff]  ;;  %v797_v1 = vld [vmem:[#allocation9 + $0xf8] sm:$0xff] }
  0x83   : > { %1594 = vmatpush3.msra.mxu1 %v428_v24  ;;  %1557 = vmatprep.subr.mxu0 %v448_v26  ;;  %v641_v56 = vld [vmem:[#allocation7 + $0x140] sm:$0xff]  ;;  %v638_v59 = vld [vmem:[#allocation7 + $0x128] sm:$0xff]  ;;  %v776_v2 = vld [vmem:[#allocation9 + $0x78] sm:$0xff] }
  0x84   : > { %1595 = vmatprep.subr.mxu1 %v427_v27  ;;  %1558 = vmatpush3.msra.mxu0 %v448_v26  ;;  %v637_v60 = vld [vmem:[#allocation7 + $0x120] sm:$0xff]  ;;  %v634_v63 = vld [vmem:[#allocation7 + $0x108] sm:$0xff]  ;;  %v796_v3 = vld [vmem:[#allocation9 + $0xf0] sm:$0xff] }
  0x85   : > { %1596 = vmatpush3.msra.mxu1 %v427_v27  ;;  %1559 = vmatprep.subr.mxu0 %v447_v29  ;;  %v633_v0 = vld [vmem:[#allocation7 + $0x100] sm:$0xff]  ;;  %v775_v4 = vld [vmem:[#allocation9 + $0x70] sm:$0xff]  ;;  %v795_v5 = vld [vmem:[#allocation9 + $0xe8] sm:$0xff] }
  0x86   : > { %1597 = vmatprep.subr.mxu1 %v426_v30  ;;  %1560 = vmatpush3.msra.mxu0 %v447_v29  ;;  %v774_v6 = vld [vmem:[#allocation9 + $0x68] sm:$0xff]  ;;  %v794_v7 = vld [vmem:[#allocation9 + $0xe0] sm:$0xff]  ;;  %v793_v9 = vld [vmem:[#allocation9 + $0xd8] sm:$0xff] }
  0x87   : > { %1598 = vmatpush3.msra.mxu1 %v426_v30  ;;  %1561 = vmatprep.subr.mxu0 %v446_v31  ;;  %v773_v8 = vld [vmem:[#allocation9 + $0x60] sm:$0xff]  ;;  %v772_v10 = vld [vmem:[#allocation9 + $0x58] sm:$0xff]  ;;  %v792_v11 = vld [vmem:[#allocation9 + $0xd0] sm:$0xff] }
  0x88   : > { %1599 = vmatprep.subr.mxu1 %v425_v32  ;;  %1562 = vmatpush3.msra.mxu0 %v446_v31  ;;  %v771_v12 = vld [vmem:[#allocation9 + $0x50] sm:$0xff]  ;;  %v791_v13 = vld [vmem:[#allocation9 + $0xc8] sm:$0xff]  ;;  %v790_v15 = vld [vmem:[#allocation9 + $0xc0] sm:$0xff] }
  0x89   : > { %1600 = vmatpush3.msra.mxu1 %v425_v32  ;;  %1563 = vmatprep.subr.mxu0 %v445_v33  ;;  %v770_v14 = vld [vmem:[#allocation9 + $0x48] sm:$0xff]  ;;  %v769_v16 = vld [vmem:[#allocation9 + $0x40] sm:$0xff]  ;;  %v789_v17 = vld [vmem:[#allocation9 + $0xb8] sm:$0xff] }
  0x8a   : > { %1601 = vmatprep.subr.mxu1 %v424_v34  ;;  %1564 = vmatpush3.msra.mxu0 %v445_v33  ;;  %v768_v18 = vld [vmem:[#allocation9 + $0x38] sm:$0xff]  ;;  %v788_v21 = vld [vmem:[#allocation9 + $0xb0] sm:$0xff]  ;;  %v787_v23 = vld [vmem:[#allocation9 + $0xa8] sm:$0xff] }
  0x8b   : > { %1602 = vmatpush3.msra.mxu1 %v424_v34  ;;  %1565 = vmatprep.subr.mxu0 %v444_v35  ;;  %v767_v22 = vld [vmem:[#allocation9 + $0x30] sm:$0xff]  ;;  %v766_v24 = vld [vmem:[#allocation9 + $0x28] sm:$0xff]  ;;  %v786_v26 = vld [vmem:[#allocation9 + $0xa0] sm:$0xff] }
  0x8c   : > { %1603 = vmatprep.subr.mxu1 %v423_v36  ;;  %1566 = vmatpush3.msra.mxu0 %v444_v35  ;;  %v765_v27 = vld [vmem:[#allocation9 + $0x20] sm:$0xff]  ;;  %v785_v29 = vld [vmem:[#allocation9 + $0x98] sm:$0xff]  ;;  %v784_v31 = vld [vmem:[#allocation9 + $0x90] sm:$0xff] }
  0x8d   : > { %1604 = vmatpush3.msra.mxu1 %v423_v36  ;;  %1567 = vmatprep.subr.mxu0 %v443_v37  ;;  %v764_v30 = vld [vmem:[#allocation9 + $0x18] sm:$0xff]  ;;  %v763_v32 = vld [vmem:[#allocation9 + $0x10] sm:$0xff]  ;;  %v783_v33 = vld [vmem:[#allocation9 + $0x88] sm:$0xff] }
  0x8e   : > { %1605 = vmatprep.subr.mxu1 %v422_v38  ;;  %1568 = vmatpush3.msra.mxu0 %v443_v37  ;;  %v762_v34 = vld [vmem:[#allocation9 + $0x8] sm:$0xff]  ;;  %v782_v35 = vld [vmem:[#allocation9 + $0x80] sm:$0xff]  ;;  %v988_v37 = vld [vmem:[#allocation9 + $0x178] sm:$0xff] }
  0x8f   : > { %1606 = vmatpush3.msra.mxu1 %v422_v38  ;;  %1569 = vmatprep.subr.mxu0 %v442_v39  ;;  %v761_v36 = vld [vmem:[#allocation9] sm:$0xff]  ;;  %v2344_v38 = vld [vmem:[#allocation10 + $0x78] sm:$0xff] }
  0x90   : > { %1607 = vmatprep.subr.mxu1 %v421_v40  ;;  %1570 = vmatpush3.msra.mxu0 %v442_v39 }
  0x91   : > { %1571 = vmatprep.mubr.f32.mxu0 %v437_v41  ;;  %1608 = vmatpush3.msra.mxu1 %v421_v40 }
  0x92   : > { %1609 = vmatprep.mubr.f32.mxu1 %v417_v42  ;;  %1572 = vmatmul.mubr.f32.vlgmr.msra.gmra.mxu0 %v438_v43 }
  0x93   : > { %1610 = vmatmul.mubr.f32.vlgmr.msra.gmra.mxu1 %v418_v44  ;;  %1615 = vmatprep.subr.mxu0 %v648_v45 }
  0x94   : > { %1574 = vmatprep.mubr.f32.mxu0 %v439_v46  ;;  %1616 = vmatpush3.msra.mxu0 %v648_v45 }
  0x95   : > { %1612 = vmatprep.mubr.f32.mxu1 %v419_v47  ;;  %1617 = vmatprep.subr.mxu0 %v647_v48 }
  0x96   : > { %1618 = vmatpush3.msra.mxu0 %v647_v48  ;;  %1653 = vmatprep.subr.mxu1 %v797_v1  ;;  %v1389_v48 = vld [vmem:[%s2486_s2] ss:$0 sm:$0xff] }
  0x97   : > { %1613 = vmatmul.mubr.f32.gmra.mxu1 %v420_v49  ;;  %1619 = vmatprep.subr.mxu0 %v646_v50 }
  0x98   : > { %1575 = vmatmul.mubr.f32.gmra.mxu0 %v440_v51  ;;  %1654 = vmatpush3.msra.mxu1 %v797_v1 }
  0x99   : > { %1620 = vmatpush3.msra.mxu0 %v646_v50  ;;  %1647 = vmatprep.mubr.f32.mxu0 %v2325_v19 }
  0x9a   : > { %1621 = vmatprep.subr.mxu0 %v645_v52  ;;  %1655 = vmatprep.subr.mxu1 %v796_v3 }
  0x9b   : > { %1622 = vmatpush3.msra.mxu0 %v645_v52  ;;  %1656 = vmatpush3.msra.mxu1 %v796_v3 }
  0x9c   : > { %1623 = vmatprep.subr.mxu0 %v644_v53  ;;  %1657 = vmatprep.subr.mxu1 %v795_v5 }
  0x9d   : > { %1624 = vmatpush3.msra.mxu0 %v644_v53  ;;  %1658 = vmatpush3.msra.mxu1 %v795_v5 }
  0x9e   : > { %1625 = vmatprep.subr.mxu0 %v643_v54  ;;  %1659 = vmatprep.subr.mxu1 %v794_v7 }
  0x9f   : > { %1626 = vmatpush3.msra.mxu0 %v643_v54  ;;  %1660 = vmatpush3.msra.mxu1 %v794_v7 }
  0xa0   : > { %1627 = vmatprep.subr.mxu0 %v642_v55  ;;  %1661 = vmatprep.subr.mxu1 %v793_v9 }
  0xa1   : > { %1628 = vmatpush3.msra.mxu0 %v642_v55  ;;  %1662 = vmatpush3.msra.mxu1 %v793_v9  ;;  %v2365_v9 = vld [vmem:[#allocation10 + $0x70] sm:$0xff] }
  0xa2   : > { %1629 = vmatprep.subr.mxu0 %v641_v56  ;;  %1663 = vmatprep.subr.mxu1 %v792_v11 }
  0xa3   : > { %1630 = vmatpush3.msra.mxu0 %v641_v56  ;;  %1664 = vmatpush3.msra.mxu1 %v792_v11 }
  0xa4   : > { %1631 = vmatprep.subr.mxu0 %v640_v57  ;;  %1665 = vmatprep.subr.mxu1 %v791_v13 }
  0xa5   : > { %1632 = vmatpush3.msra.mxu0 %v640_v57  ;;  %1666 = vmatpush3.msra.mxu1 %v791_v13 }
  0xa6   : > { %1633 = vmatprep.subr.mxu0 %v639_v58  ;;  %1667 = vmatprep.subr.mxu1 %v790_v15 }
  0xa7   : > { %1634 = vmatpush3.msra.mxu0 %v639_v58  ;;  %1668 = vmatpush3.msra.mxu1 %v790_v15  ;;  %v985_v15 = vld [vmem:[#allocation9 + $0x160] sm:$0xff] }
  0xa8   : > { %1635 = vmatprep.subr.mxu0 %v638_v59  ;;  %1669 = vmatprep.subr.mxu1 %v789_v17 }
  0xa9   : > { %1636 = vmatpush3.msra.mxu0 %v638_v59  ;;  %1670 = vmatpush3.msra.mxu1 %v789_v17  ;;  %v984_v17 = vld [vmem:[#allocation9 + $0x158] sm:$0xff] }
  0xaa   : > { %1637 = vmatprep.subr.mxu0 %v637_v60  ;;  %1671 = vmatprep.subr.mxu1 %v788_v21 }
  0xab   : > { %1638 = vmatpush3.msra.mxu0 %v637_v60  ;;  %1672 = vmatpush3.msra.mxu1 %v788_v21  ;;  %v983_v21 = vld [vmem:[#allocation9 + $0x150] sm:$0xff] }
  0xac   : > { %1639 = vmatprep.subr.mxu0 %v636_v61  ;;  %1673 = vmatprep.subr.mxu1 %v787_v23 }
  0xad   : > { %1640 = vmatpush3.msra.mxu0 %v636_v61  ;;  %1674 = vmatpush3.msra.mxu1 %v787_v23  ;;  %v982_v23 = vld [vmem:[#allocation9 + $0x148] sm:$0xff] }
  0xae   : > { %1641 = vmatprep.subr.mxu0 %v635_v62  ;;  %1675 = vmatprep.subr.mxu1 %v786_v26 }
  0xaf   : > { %1642 = vmatpush3.msra.mxu0 %v635_v62  ;;  %1676 = vmatpush3.msra.mxu1 %v786_v26  ;;  %v981_v26 = vld [vmem:[#allocation9 + $0x140] sm:$0xff] }
  0xb0   : > { %1643 = vmatprep.subr.mxu0 %v634_v63  ;;  %1677 = vmatprep.subr.mxu1 %v785_v29 }
  0xb1   : > { %1644 = vmatpush3.msra.mxu0 %v634_v63  ;;  %1678 = vmatpush3.msra.mxu1 %v785_v29  ;;  %v980_v29 = vld [vmem:[#allocation9 + $0x138] sm:$0xff] }
  0xb2   : > { %1645 = vmatprep.subr.mxu0 %v633_v0  ;;  %1679 = vmatprep.subr.mxu1 %v784_v31 }
  0xb3   : > { %1646 = vmatpush3.msra.mxu0 %v633_v0  ;;  %1680 = vmatpush3.msra.mxu1 %v784_v31  ;;  %v979_v31 = vld [vmem:[#allocation9 + $0x130] sm:$0xff] }
  0xb4   : > { %1648 = vmatmul.mubr.f32.vlgmr.msra.gmra.mxu0 %v2329_v20  ;;  %1691 = vmatprep.subr.mxu0 %v776_v2 }
  0xb5   : > { %1650 = vmatprep.mubr.f32.mxu0 %v2333_v25  ;;  %1692 = vmatpush3.msra.mxu0 %v776_v2 }
  0xb6   : > { %1693 = vmatprep.subr.mxu0 %v775_v4  ;;  %1681 = vmatprep.subr.mxu1 %v783_v33 }
  0xb7   : > { %1694 = vmatpush3.msra.mxu0 %v775_v4  ;;  %1682 = vmatpush3.msra.mxu1 %v783_v33  ;;  %v978_v33 = vld [vmem:[#allocation9 + $0x128] sm:$0xff] }
  0xb8   : > { %1651 = vmatmul.mubr.f32.gmra.mxu0 %v2337_v28  ;;  %1695 = vmatprep.subr.mxu0 %v774_v6 }
  0xb9   : > { %1696 = vmatpush3.msra.mxu0 %v774_v6  ;;  %1683 = vmatprep.subr.mxu1 %v782_v35 }
  0xba   : > { %1697 = vmatprep.subr.mxu0 %v773_v8  ;;  %1684 = vmatpush3.msra.mxu1 %v782_v35  ;;  %v977_v35 = vld [vmem:[#allocation9 + $0x120] sm:$0xff] }
  0xbb   : > { %1698 = vmatpush3.msra.mxu0 %v773_v8  ;;  %1729 = vmatprep.subr.mxu1 %v988_v37  ;;  %v987_v8 = vld [vmem:[#allocation9 + $0x170] sm:$0xff] }
  0xbc   : > { %1699 = vmatprep.subr.mxu0 %v772_v10 }
  0xbd   : > { %1700 = vmatpush3.msra.mxu0 %v772_v10  ;;  %v986_v10 = vld [vmem:[#allocation9 + $0x168] sm:$0xff] }
  0xbe   : > { %1701 = vmatprep.subr.mxu0 %v771_v12 }
  0xbf   : > { %1702 = vmatpush3.msra.mxu0 %v771_v12 }
  0xc0   : > { %1703 = vmatprep.subr.mxu0 %v770_v14 }
  0xc1   : > { %1704 = vmatpush3.msra.mxu0 %v770_v14 }
  0xc2   : > { %1705 = vmatprep.subr.mxu0 %v769_v16 }
  0xc3   : > { %1706 = vmatpush3.msra.mxu0 %v769_v16  ;;  %v2369_v16 = vld [vmem:[#allocation10 + $0x68] sm:$0xff] }
  0xc4   : > { %1707 = vmatprep.subr.mxu0 %v768_v18 }
  0xc5   : > { %1708 = vmatpush3.msra.mxu0 %v768_v18  ;;  %v2372_v18 = vld [vmem:[#allocation10 + $0x60] sm:$0xff] }
  0xc6   : > { %1709 = vmatprep.subr.mxu0 %v767_v22 }
  0xc7   : > { %1710 = vmatpush3.msra.mxu0 %v767_v22  ;;  %v2376_v22 = vld [vmem:[#allocation10 + $0x58] sm:$0xff] }
  0xc8   : > { %1711 = vmatprep.subr.mxu0 %v766_v24 }
  0xc9   : > { %1712 = vmatpush3.msra.mxu0 %v766_v24  ;;  %v2380_v24 = vld [vmem:[#allocation10 + $0x50] sm:$0xff] }
  0xca   : > { %1713 = vmatprep.subr.mxu0 %v765_v27 }
  0xcb   : > { %1714 = vmatpush3.msra.mxu0 %v765_v27  ;;  %v2384_v27 = vld [vmem:[#allocation10 + $0x48] sm:$0xff] }
  0xcc   : > { %1715 = vmatprep.subr.mxu0 %v764_v30 }
  0xcd   : > { %1716 = vmatpush3.msra.mxu0 %v764_v30  ;;  %v2388_v30 = vld [vmem:[#allocation10 + $0x40] sm:$0xff] }
  0xce   : > { %1717 = vmatprep.subr.mxu0 %v763_v32 }
  0xcf   : > { %1718 = vmatpush3.msra.mxu0 %v763_v32  ;;  %v2392_v32 = vld [vmem:[#allocation10 + $0x38] sm:$0xff] }
  0xd0   : > { %1719 = vmatprep.subr.mxu0 %v762_v34 }
  0xd1   : > { %1720 = vmatpush3.msra.mxu0 %v762_v34  ;;  %v2396_v34 = vld [vmem:[#allocation10 + $0x30] sm:$0xff] }
  0xd2   : > { %1721 = vmatprep.subr.mxu0 %v761_v36 }
  0xd3   : > { %1722 = vmatpush3.msra.mxu0 %v761_v36  ;;  %v1098_v36 = vld [vmem:[#allocation10 + $0x28] sm:$0xff] }
  0xd4   : > { %1767 = vmatprep.subr.mxu0 %v2344_v38 }
 0x152   : > { %v1573_v39 = vpop.f32.mrf.mxu0 }
 0x153   : > { %v1611_v40 = vpop.f32.mrf.mxu1 }
 0x154   : > { %v524_v41 = vpop.f32.mrf.mxu0  ;;  %v615_v46 = vadd.f32 %v1611_v40, %v1573_v39  ;;  %v1097_v39 = vld [vmem:[#allocation10 + $0x20] sm:$0xff]  ;;  %v975_v40 = vld [vmem:[#allocation9 + $0x110] sm:$0xff] }
 0x155   : > { %v609_v43 = vpop.f32.mrf.mxu1 }
 0x156   : > { %v610_v49 = vadd.f32 %v609_v43, %v524_v41  ;;  %v1096_v41 = vld [vmem:[#allocation10 + $0x18] sm:$0xff]  ;;  %v1095_v43 = vld [vmem:[#allocation10 + $0x10] sm:$0xff] }
 0x157   : > { %v1614_v44 = vpop.f32.mrf.mxu1 }
 0x158   : > { %v1576_v42 = vpop.f32.mrf.mxu0 }
 0x159   : > { %v619_v51 = vpop.f32.mrf.mxu1  ;;  %v625_v53 = vadd.f32 %v1614_v44, %v1576_v42  ;;  %v974_v42 = vld [vmem:[#allocation9 + $0x108] sm:$0xff]  ;;  %v973_v44 = vld [vmem:[#allocation9 + $0x100] sm:$0xff] }
 0x15a   : > { %v534_v45 = vpop.f32.mrf.mxu0 }
 0x15b   : > { %v620_v57 = vadd.f32 %v619_v51, %v534_v45  ;;  %v1094_v45 = vld [vmem:[#allocation10 + $0x8] sm:$0xff] }
 0x174   : > { %v1649_v47 = vpop.f32.mrf.mxu0 }
 0x175   : > { %v735_v50 = vadd.f32 %v1649_v47, %v615_v46  ;;  %v1093_v46 = vld [vmem:[#allocation10] sm:$0xff] }
 0x176   : > { %v715_v52 = vpop.f32.mrf.mxu0 }
 0x177   : > { %v2350_v54 = vadd.f32 %v1389_v48, %v735_v50  ;;  %v734_v55 = vadd.f32 %v715_v52, %v610_v49  ;;  %v1390_v52 = vld [vmem:[%s2488_s4] ss:$0 sm:$0xff] }
 0x178   : > { %v1652_v56 = vpop.f32.mrf.mxu0 }
 0x179   : > { %v750_v58 = vmax.f32 %v2350_v54, 0.0  ;;  %v745_v59 = vadd.f32 %v1389_v48, %v734_v55  ;;  %v737_v60 = vadd.f32 %v1652_v56, %v625_v53 }
 0x17a   : > { %v725_v61 = vpop.f32.mrf.mxu0 }
 0x17b   : > { %754 = vst [vmem:[#allocation3 + $0xc] sm:$0xff] %v750_v58  ;;  %v749_v62 = vmax.f32 %v745_v59, 0.0  ;;  %v2355_v63 = vadd.f32 %v1389_v48, %v737_v60  ;;  %v736_v0 = vadd.f32 %v725_v61, %v620_v57 }
 0x17d   : > { %753 = vst [vmem:[#allocation3 + $0x4] sm:$0xff] %v749_v62  ;;  %v752_v1 = vmax.f32 %v2355_v63, 0.0  ;;  %v2358_v2 = vadd.f32 %v1389_v48, %v736_v0 }
 0x17f   : > { %756 = vst [vmem:[#allocation3 + $0x24] sm:$0xff] %v752_v1  ;;  %v751_v3 = vmax.f32 %v2358_v2, 0.0 }
 0x181   : > { %755 = vst [vmem:[#allocation3 + $0x1c] sm:$0xff] %v751_v3 }
 0x184   : > { %v777_v4 = vld [vmem:[#allocation3 + $0x2] sm:$0xff]  ;;  %v778_v6 = vld [vmem:[#allocation3 + $0xa] sm:$0xff] }
 0x185   : > { %v757_v5 = vld [vmem:[#allocation3] sm:$0xff]  ;;  %1685 = vmatprep.mubr.f32.mxu1 %v777_v4  ;;  %v758_v7 = vld [vmem:[#allocation3 + $0x8] sm:$0xff] }
 0x186   : > { %1723 = vmatprep.mubr.f32.mxu0 %v757_v5  ;;  %1686 = vmatmul.mubr.f32.vlgmr.msra.gmra.mxu1 %v778_v6 }
 0x187   : > { %1724 = vmatmul.mubr.f32.vlgmr.msra.gmra.mxu0 %v758_v7  ;;  %1730 = vmatpush3.msra.mxu1 %v988_v37  ;;  %v976_v37 = vld [vmem:[#allocation9 + $0x118] sm:$0xff] }
 0x188   : > { %1768 = vmatpush3.msra.mxu0 %v2344_v38  ;;  %1731 = vmatprep.subr.mxu1 %v987_v8  ;;  %v779_v11 = vld [vmem:[#allocation3 + $0x1a] sm:$0xff]  ;;  %v780_v13 = vld [vmem:[#allocation3 + $0x22] sm:$0xff] }
 0x189   : > { %v759_v12 = vld [vmem:[#allocation3 + $0x18] sm:$0xff]  ;;  %1769 = vmatprep.subr.mxu0 %v2365_v9  ;;  %1732 = vmatpush3.msra.mxu1 %v987_v8  ;;  %v760_v14 = vld [vmem:[#allocation3 + $0x20] sm:$0xff] }
 0x18a   : > { %1688 = vmatprep.mubr.f32.mxu1 %v779_v11  ;;  %1726 = vmatprep.mubr.f32.mxu0 %v759_v12 }
 0x18b   : > { %1733 = vmatprep.subr.mxu1 %v986_v10  ;;  %1689 = vmatmul.mubr.f32.gmra.mxu1 %v780_v13 }
 0x18c   : > { %1727 = vmatmul.mubr.f32.gmra.mxu0 %v760_v14  ;;  %1734 = vmatpush3.msra.mxu1 %v986_v10 }
 0x18d   : > { %1761 = vmatprep.mubr.f32.mxu1 %v749_v62  ;;  %1735 = vmatprep.subr.mxu1 %v985_v15 }
 0x18e   : > { %1770 = vmatpush3.msra.mxu0 %v2365_v9  ;;  %1736 = vmatpush3.msra.mxu1 %v985_v15 }
 0x18f   : > { %1771 = vmatprep.subr.mxu0 %v2369_v16  ;;  %1737 = vmatprep.subr.mxu1 %v984_v17 }
 0x190   : > { %1772 = vmatpush3.msra.mxu0 %v2369_v16  ;;  %1738 = vmatpush3.msra.mxu1 %v984_v17 }
 0x191   : > { %1773 = vmatprep.subr.mxu0 %v2372_v18  ;;  %1739 = vmatprep.subr.mxu1 %v983_v21 }
 0x192   : > { %1774 = vmatpush3.msra.mxu0 %v2372_v18  ;;  %1740 = vmatpush3.msra.mxu1 %v983_v21 }
 0x193   : > { %1775 = vmatprep.subr.mxu0 %v2376_v22  ;;  %1741 = vmatprep.subr.mxu1 %v982_v23 }
 0x194   : > { %1776 = vmatpush3.msra.mxu0 %v2376_v22  ;;  %1742 = vmatpush3.msra.mxu1 %v982_v23 }
 0x195   : > { %1777 = vmatprep.subr.mxu0 %v2380_v24  ;;  %1743 = vmatprep.subr.mxu1 %v981_v26 }
 0x196   : > { %1778 = vmatpush3.msra.mxu0 %v2380_v24  ;;  %1744 = vmatpush3.msra.mxu1 %v981_v26 }
 0x197   : > { %1779 = vmatprep.subr.mxu0 %v2384_v27  ;;  %1745 = vmatprep.subr.mxu1 %v980_v29 }
 0x198   : > { %1780 = vmatpush3.msra.mxu0 %v2384_v27  ;;  %1746 = vmatpush3.msra.mxu1 %v980_v29 }
 0x199   : > { %1781 = vmatprep.subr.mxu0 %v2388_v30  ;;  %1747 = vmatprep.subr.mxu1 %v979_v31 }
 0x19a   : > { %1782 = vmatpush3.msra.mxu0 %v2388_v30  ;;  %1748 = vmatpush3.msra.mxu1 %v979_v31 }
 0x19b   : > { %1783 = vmatprep.subr.mxu0 %v2392_v32  ;;  %1749 = vmatprep.subr.mxu1 %v978_v33 }
 0x19c   : > { %1784 = vmatpush3.msra.mxu0 %v2392_v32  ;;  %1750 = vmatpush3.msra.mxu1 %v978_v33 }
 0x19d   : > { %1785 = vmatprep.subr.mxu0 %v2396_v34  ;;  %1751 = vmatprep.subr.mxu1 %v977_v35 }
 0x19e   : > { %1786 = vmatpush3.msra.mxu0 %v2396_v34  ;;  %1752 = vmatpush3.msra.mxu1 %v977_v35 }
 0x19f   : > { %1787 = vmatprep.subr.mxu0 %v1098_v36  ;;  %1753 = vmatprep.subr.mxu1 %v976_v37 }
 0x1a0   : > { %1788 = vmatpush3.msra.mxu0 %v1098_v36  ;;  %1754 = vmatpush3.msra.mxu1 %v976_v37 }
 0x1a1   : > { %1789 = vmatprep.subr.mxu0 %v1097_v39  ;;  %1755 = vmatprep.subr.mxu1 %v975_v40 }
 0x1a2   : > { %1790 = vmatpush3.msra.mxu0 %v1097_v39  ;;  %1756 = vmatpush3.msra.mxu1 %v975_v40 }
 0x1a3   : > { %1791 = vmatprep.subr.mxu0 %v1096_v41  ;;  %1757 = vmatprep.subr.mxu1 %v974_v42 }
 0x1a4   : > { %1792 = vmatpush3.msra.mxu0 %v1096_v41  ;;  %1758 = vmatpush3.msra.mxu1 %v974_v42 }
 0x1a5   : > { %1793 = vmatprep.subr.mxu0 %v1095_v43  ;;  %1759 = vmatprep.subr.mxu1 %v973_v44 }
 0x1a6   : > { %1794 = vmatpush3.msra.mxu0 %v1095_v43  ;;  %1760 = vmatpush3.msra.mxu1 %v973_v44 }
 0x1a7   : > { %1795 = vmatprep.subr.mxu0 %v1094_v45  ;;  %1762 = vmatmul.mubr.f32.vlgmr.msra.gmra.mxu1 %v750_v58  ;;  %v1391_v58 = vld [vmem:[%s2490_s6] ss:$0 sm:$0xff] }
 0x1a8   : > { %1805 = vmatprep.subr.mxu1 %v2344_v38  ;;  %1764 = vmatprep.mubr.f32.mxu1 %v751_v3 }
 0x1a9   : > { %1821 = vmatpush3.msra.mxu1 %v2344_v38  ;;  %1796 = vmatpush3.msra.mxu0 %v1094_v45 }
 0x1aa   : > { %1806 = vmatprep.subr.mxu1 %v2365_v9  ;;  %1797 = vmatprep.subr.mxu0 %v1093_v46 }
 0x1ab   : > { %1822 = vmatpush3.msra.mxu1 %v2365_v9  ;;  %1798 = vmatpush3.msra.mxu0 %v1093_v46 }
 0x1ac   : > { %1799 = vmatprep.mubr.f32.mxu0 %v2325_v19  ;;  %1765 = vmatmul.mubr.f32.gmra.mxu1 %v752_v1 }
 0x1ad   : > { %1807 = vmatprep.subr.mxu1 %v2369_v16  ;;  %1800 = vmatmul.mubr.f32.vlgmr.msra.gmra.mxu0 %v2329_v20 }
 0x1ae   : > { %1823 = vmatpush3.msra.mxu1 %v2369_v16  ;;  %1802 = vmatprep.mubr.f32.mxu1 %v2333_v25 }
 0x1af   : > { %1808 = vmatprep.subr.mxu1 %v2372_v18 }
 0x1b0   : > { %1824 = vmatpush3.msra.mxu1 %v2372_v18 }
 0x1b1   : > { %1809 = vmatprep.subr.mxu1 %v2376_v22 }
 0x1b2   : > { %1825 = vmatpush3.msra.mxu1 %v2376_v22 }
 0x1b3   : > { %1810 = vmatprep.subr.mxu1 %v2380_v24 }
 0x1b4   : > { %1826 = vmatpush3.msra.mxu1 %v2380_v24 }
 0x1b5   : > { %1811 = vmatprep.subr.mxu1 %v2384_v27 }
 0x1b6   : > { %1827 = vmatpush3.msra.mxu1 %v2384_v27 }
 0x1b7   : > { %1812 = vmatprep.subr.mxu1 %v2388_v30 }
 0x1b8   : > { %1828 = vmatpush3.msra.mxu1 %v2388_v30 }
 0x1b9   : > { %1813 = vmatprep.subr.mxu1 %v2392_v32 }
 0x1ba   : > { %1829 = vmatpush3.msra.mxu1 %v2392_v32 }
 0x1bb   : > { %1814 = vmatprep.subr.mxu1 %v2396_v34 }
 0x1bc   : > { %1830 = vmatpush3.msra.mxu1 %v2396_v34 }
 0x1bd   : > { %1815 = vmatprep.subr.mxu1 %v1098_v36 }
 0x1be   : > { %1831 = vmatpush3.msra.mxu1 %v1098_v36 }
 0x1bf   : > { %1816 = vmatprep.subr.mxu1 %v1097_v39 }
 0x1c0   : > { %1832 = vmatpush3.msra.mxu1 %v1097_v39 }
 0x1c1   : > { %1817 = vmatprep.subr.mxu1 %v1096_v41 }
 0x1c2   : > { %1833 = vmatpush3.msra.mxu1 %v1096_v41 }
 0x1c3   : > { %1818 = vmatprep.subr.mxu1 %v1095_v43 }
 0x1c4   : > { %1834 = vmatpush3.msra.mxu1 %v1095_v43 }
 0x1c5   : > { %1819 = vmatprep.subr.mxu1 %v1094_v45 }
 0x1c6   : > { %1835 = vmatpush3.msra.mxu1 %v1094_v45 }
 0x1c7   : > { %1820 = vmatprep.subr.mxu1 %v1093_v46 }
 0x1c8   : > { %1836 = vmatpush3.msra.mxu1 %v1093_v46 }
 0x1c9   : > { %1803 = vmatmul.mubr.f32.vlgmr.msra.gmra.mxu1 %v2337_v28 }
 0x246   : > { %v1687_v19 = vpop.f32.mrf.mxu1 }
 0x247   : > { %v1725_v25 = vpop.f32.mrf.mxu0 }
 0x248   : > { %v864_v20 = vpop.f32.mrf.mxu1  ;;  %v955_v49 = vadd.f32 %v1725_v25, %v1687_v19 }
 0x249   : > { %v949_v47 = vpop.f32.mrf.mxu0 }
 0x24a   : > { %v950_v53 = vadd.f32 %v949_v47, %v864_v20 }
 0x24b   : > { %v1690_v38 = vpop.f32.mrf.mxu1 }
 0x24c   : > { %v1728_v50 = vpop.f32.mrf.mxu0 }
 0x24d   : > { %v874_v48 = vpop.f32.mrf.mxu1  ;;  %v965_v7 = vadd.f32 %v1728_v50, %v1690_v38 }
 0x24e   : > { %v959_v57 = vpop.f32.mrf.mxu0 }
 0x24f   : > { %v960_v9 = vadd.f32 %v959_v57, %v874_v48 }
 0x267   : > { %v1763_v51 = vpop.f32.mrf.mxu1 }
 0x268   : > { %v1075_v54 = vadd.f32 %v1763_v51, %v955_v49 }
 0x269   : > { %v1055_v55 = vpop.f32.mrf.mxu1 }
 0x26a   : > { %v1086_v56 = vadd.f32 %v1390_v52, %v1075_v54  ;;  %v1074_v28 = vadd.f32 %v1055_v55, %v950_v53 }
 0x26c   : > { %v1090_v59 = vmax.f32 %v1086_v56, 0.0  ;;  %v1085_v60 = vadd.f32 %v1390_v52, %v1074_v28  ;;  %v1766_v6 = vpop.f32.mrf.mxu1 }
 0x26d   : > { %v1801_v61 = vpop.f32.mrf.mxu0  ;;  %v1077_v10 = vadd.f32 %v1766_v6, %v965_v7 }
 0x26e   : > { %v1089_v62 = vmax.f32 %v1085_v60, 0.0  ;;  %v1188_v63 = vadd.f32 %v1801_v61, %v1391_v58  ;;  %v1065_v8 = vpop.f32.mrf.mxu1 }
 0x26f   : > { %v1182_v0 = vpop.f32.mrf.mxu0  ;;  %v1076_v11 = vadd.f32 %v1065_v8, %v960_v9  ;;  %v1088_v12 = vadd.f32 %v1390_v52, %v1077_v10 }
 0x270   : > { %v1202_v1 = vadd.f32 %v1188_v63, %v1090_v59  ;;  %v1183_v2 = vadd.f32 %v1391_v58, %v1182_v0 }
 0x271   : > { %v1087_v13 = vadd.f32 %v1390_v52, %v1076_v11  ;;  %v1092_v15 = vmax.f32 %v1088_v12, 0.0 }
 0x272   : > { %v1206_v3 = vmax.f32 %v1202_v1, 0.0  ;;  %v1201_v4 = vadd.f32 %v1183_v2, %v1089_v62 }
 0x273   : > { %v1091_v18 = vmax.f32 %v1087_v13, 0.0 }
 0x274   : > { %1210 = vst [vmem:[%s2320_s11 + $0x8] sm:$0xff] %v1206_v3  ;;  %v1205_v5 = vmax.f32 %v1201_v4, 0.0 }
 0x276   : > { %1209 = vst [vmem:[%s2320_s11] sm:$0xff] %v1205_v5 }
 0x289   : > { %v1804_v14 = vpop.f32.mrf.mxu1 }
 0x28a   : > { %v1198_v16 = vadd.f32 %v1804_v14, %v1391_v58 }
 0x28b   : > { %v1192_v17 = vpop.f32.mrf.mxu1 }
 0x28c   : > { %v1204_v21 = vadd.f32 %v1198_v16, %v1092_v15  ;;  %v1193_v22 = vadd.f32 %v1391_v58, %v1192_v17 }
 0x28e   : > { %v1208_v23 = vmax.f32 %v1204_v21, 0.0  ;;  %v1203_v24 = vadd.f32 %v1193_v22, %v1091_v18 }
 0x290   : > { %1212 = vst [vmem:[%s2320_s11 + $0x18] sm:$0xff] %v1208_v23  ;;  %v1207_v26 = vmax.f32 %v1203_v24, 0.0 }
 0x292   : > { %1211 = vst [vmem:[%s2320_s11 + $0x10] sm:$0xff] %v1207_v26 }
 0x293   : > { %s1398_s16 = sshll.u32 %s2086_s27, 8  ;;  %s1240_s21 = sshll.u32 %s2320_s11, 4  ;;  %s1241_s21 = int_to_ptr.vmem [resolvable:$true] %s1240_s21 }
 0x294   : > { %s1229_s10 = scalar_lea.hbm %s2491_s7, %s1398_s16  ;;  %s2108_s8 = smov 256  }
 0x295   : > { %p2509_p5 = scmp.ne.s32.totalorder %s2501_s15, 0  ;;  %s2109_s1 = smov 768  }
 0x296   : > { %s2110_s3 = smov 2   ;;  %s2111_s5 = smov 128  }
 0x297   : > { %1858 = sst [smem:[#allocation16]] (%p2509_p5), %s2108_s8  ;;  %s2112_s27 = smov 8  }
 0x298   : > { %1859 = sst [smem:[#allocation16 + $0x1]] (%p2509_p5), %s2109_s1  ;;  %s2113_s13 = smov 131072  }
 0x299   : > { %1860 = sst [smem:[#allocation16 + $0x2]] (%p2509_p5), %s2110_s3  ;;  %s2114_s11 = smov 0  }
 0x29a   : > { %1861 = sst [smem:[#allocation16 + $0x3]] (%p2509_p5), %s2111_s5 }
 0x29b   : > { %1862 = sst [smem:[#allocation16 + $0x4]] (%p2509_p5), %s2111_s5 }
 0x29c   : > { %1863 = sst [smem:[#allocation16 + $0x5]] (%p2509_p5), %s2112_s27 }
 0x29d   : > { %1864 = dma.general (%p2509_p5), %s1241_s21, 512, %s1229_s10, %s1214_s9, %s2113_s13, [#allocation16], %s2114_s11, 0  }
 0x29e PF: > { %p1886_p9 = scmp.ge.s32.totalorder %s2094_s29, 2  ;;  %s1268_s12 = sand.u32 1, %s2074_s24  }
 0x29f   : > { %p2510_p0 = scmp.ne.s32.totalorder %s2503_s17, 0  ;;  %s1269_s14 = scalar_lea.sflag [#allocation6], %s1268_s12 }
 0x2a1   : > { %p1877_p2 = pnand %p1886_p9, %p2510_p0 }
 0x2a3   : > { %p1878_p3 = pneg %p1877_p2 }
 0x2a5   : > { %2069 = dma.done.wait (%p1878_p3), %s1269_s14, 512  }
 0x2a6   : > { %2071 = vsyncadd (%p1878_p3), %s1269_s14, 4294966784  ;;  %s25_s29 = sadd.s32 1, %s2094_s29   ;;  %s2511_s18 = sld [smem:[#allocation23_spill]] }
 0x2a7   : > { %p22_p6 = scmp.ge.s32.totalorder %s25_s29, 5   ;;  %s2512_s15 = sld [smem:[#allocation22_spill]] }
 0x2a8   : > { %s2513_s24 = smov %s2078_s25  ;;  %s2514_s25 = smov %s2082_s26 }
 0x2a9   : > { %s2516_s27 = smov %s2090_s28  ;;  %24 = sbr.rel (!%p22_p6) target bundleno = 12 (0xc), region = 127 }
 0x2ac   : > { %s2515_s26 = smov %s2511_s18 }
 0x2ad   : > { %s2517_s28 = smov %s2512_s15 }
 0x2ae   :  { %1274 = vsyncpa [#allocation5], 1 }
 0x2af   :  { %1276 = vsyncpa [#allocation5 + $0x1], 1 }
 0x2b0   :  { %1277 = vsyncpa [#allocation8], 1 }
 0x2b1   :  { %1278 = vsyncpa [#allocation11], 1 }
 0x2b2   :  { %1279 = vsyncpa [#allocation6], 1 }
 0x2b3   :  { %1281 = vsyncpa [#allocation6 + $0x1], 1 }

// kernel: tpu_custom_call.1
= control target key start
LH: loop header
LB: loop body
LE: loop exit
PB: predicated region body
PF: predicated region fallthrough
CT: control target
= control target key end

     0   :  { %s2484_s0 = inlined_call_operand.hbm [shape: f32[2,48,128], index: 0, kind: input, shape index: {}]   ;;  %s2485_s1 = inlined_call_operand.hbm [shape: f32[3,128,128], index: 1, kind: input, shape index: {}]   ;;  %s2486_s2 = inlined_call_operand.vmem [shape: f32[1,128], index: 2, kind: input, shape index: {}]   ;;  %s2487_s3 = inlined_call_operand.hbm [shape: f32[3,128,128], index: 3, kind: input, shape index: {}]   ;;  %s2488_s4 = inlined_call_operand.vmem [shape: f32[1,128], index: 4, kind: input, shape index: {}]   ;;  %s2489_s5 = inlined_call_operand.hbm [shape: f32[1,128,128], index: 5, kind: input, shape index: {}]   ;;  %s2490_s6 = inlined_call_operand.vmem [shape: f32[1,128], index: 6, kind: input, shape index: {}]   ;;  %s2491_s7 = inlined_call_operand.hbm [shape: f32[2,48,128], index: 7, kind: output, shape index: {}]  }
   0x1   :  { %2494 = sst [smem:[#allocation24_spill]] %s2485_s1 }
   0x2   :  { %2495 = sst [smem:[#allocation25_spill]] %s2487_s3 }
   0x3   :  { %2496 = sst [smem:[#allocation26_spill]] %s2489_s5 }
   0x4   :  { %12 = vsyncpa [#allocation5], 0 }
   0x5   :  { %14 = vsyncpa [#allocation5 + $0x1], 0 }
   0x6   :  { %15 = vsyncpa [#allocation8], 0 }
   0x7   :  { %16 = vsyncpa [#allocation11], 0 }
   0x8   :  { %17 = vsyncpa [#allocation6], 0 }
   0x9   :  { %19 = vsyncpa [#allocation6 + $0x1], 0  ;;  %s2155_s24 = smov 0   ;;  %s2157_s25 = smov 0  }
   0xa   :  { %s2159_s26 = smov 0   ;;  %s2161_s27 = smov 0  }
   0xb   :  { %s2163_s28 = smov 0   ;;  %s2165_s29 = smov 0  }
   0xc LB: > { %s1369_s30 = sadd.s32 4294967295, %s2094_s29   ;;  %s1370_s8 = sadd.s32 4294967294, %s2094_s29   ;;  %s2094_s29 = sphi %s2165_s29, %s25_s29   ;;  %s2090_s28 = sphi %s2163_s28, %s2517_s28   ;;  %s2086_s27 = sphi %s2161_s27, %s2516_s27   ;;  %s2082_s26 = sphi %s2159_s26, %s2515_s26   ;;  %s2078_s25 = sphi %s2157_s25, %s2514_s25   ;;  %s2074_s24 = sphi %s2155_s24, %s2513_s24  }
   0xd   : > { %s34_s9 = sadd.s32 1, %s2090_s28  ;;  %s46_s10 = sadd.s32 1, %s2082_s26 }
   0xe   : > { %p35_p0 = scmp.ge.s32.totalorder %s34_s9, 3  ;;  %p53_p1 = scmp.ne.s32.totalorder %s2082_s26, %s2078_s25 }
   0xf   : > { %p54_p2 = scmp.eq.s32.totalorder %s2094_s29, 0  ;;  %p59_p3 = scmp.ne.s32.totalorder %s2078_s25, %s2074_s24 }
  0x10   : > { %s2519_s9 = smov (%p35_p0, %s34_s9), 0  ;;  %p2200_p5 = scmp.eq.s32.totalorder %s1369_s30, 0 }
  0x11   : > { %2497 = sst [smem:[#allocation22_spill]] %s2519_s9  ;;  %p2196_p4 = por %p54_p2, %p53_p1 }
  0x12   : > { %s42_s13 = ssub.s32 %s2090_s28, %s2519_s9  ;;  %p211_p6 = scmp.eq.s32.totalorder %s1369_s30, 2 }
  0x13   : > { %p44_p7 = scmp.eq.s32.totalorder %s42_s13, 0  ;;  %p2208_p8 = por %p2200_p5, %p59_p3 }
  0x14   : > { %p2212_p9 = por %p211_p6, %p53_p1  ;;  %p217_p10 = scmp.eq.s32.totalorder %s1370_s8, 2 }
  0x15   : > { %s2217_s16 = scalar_select %p44_p7, %s2082_s26, %s46_s10  }
  0x16   : > { %s2501_s15 = scalar_select %p2212_p9, 1, 0 }
  0x17   : > { %2502 = sst [smem:[#allocation23_spill]] %s2217_s16  ;;  %p2219_p11 = por %p217_p10, %p59_p3 }
  0x18   : > { %p1371_p12 = scmp.ge.s32.totalorder %s2094_s29, 1  ;;  %p224_p13 = scmp.lt.s32.totalorder %s2094_s29, 4 }
  0x19   : > { %s2503_s17 = scalar_select %p2219_p11, 1, 0 }
  0x1a   : > { %p2225_p0 = pnand %p1371_p12, %p224_p13  ;;  %s2096_s19 = smov [#allocation7]  }
  0x1b   : > { %s236_s20 = sshll.u32 %s2096_s19, 4  ;;  %s2097_s21 = smov [#allocation9]   ;;  %s237_s20 = int_to_ptr.vmem [resolvable:$true] %s236_s20 }
  0x1c   : > { %p1866_p1 = pneg %p2225_p0  ;;  %s252_s22 = sshll.u32 %s2097_s21, 4  ;;  %s2237_s22 = int_to_ptr.vmem [resolvable:$true] %s252_s22 }
  0x1d   : > { %s2098_s30 = smov [#allocation10]   ;;  %s1965_s10 = scalar_lea.vmem %s237_s20, 6144 }
  0x1e   : > { %p2233_p2 = pnand %p1866_p1, %p2200_p5  ;;  %s268_s8 = sshll.u32 %s2098_s30, 4  ;;  %s2239_s8 = int_to_ptr.vmem [resolvable:$true] %s268_s8 }
  0x1f   : > { %p1966_p6 = scmp.ne.s32.totalorder %s237_s20, %s1965_s10  ;;  %p1973_p12 = scmp.lt.s32.totalorder %s237_s20, %s237_s20 }
  0x20   : > { %p1956_p3 = pneg %p2233_p2  ;;  %p1974_p13 = scmp.lt.s32.totalorder %s1965_s10, %s1965_s10 }
  0x22   : > { %p1968_p7 = pnand %p1966_p6, %p1956_p3  ;;  %p1975_p1 = por %p1974_p13, %p1973_p12 }
  0x24   : > { %p1969_p10 = pneg %p1968_p7 }
  0x26   : > { %p1976_p11 = pnand %p1975_p1, %p1969_p10 }
  0x28   : > { %1979 = shalt.err (!%p1976_p11)
}
  0x29   : > { %s2099_s13 = smov 128   ;;  %s2100_s19 = smov 8  }
  0x2a   : > { %s2506_s1 = sld [smem:[#allocation24_spill]]  ;;  %s1991_s9 = scalar_lea.vmem %s2237_s22, 6144 }
  0x2b   : > { %p1992_p6 = scmp.ne.s32.totalorder %s2237_s22, %s1991_s9  ;;  %p1999_p11 = scmp.lt.s32.totalorder %s2237_s22, %s2237_s22 }
  0x2c   : > { %p2000_p10 = scmp.lt.s32.totalorder %s1991_s9, %s1991_s9 }
  0x2d   : > { %p1994_p7 = pnand %p1992_p6, %p1956_p3 }
  0x2e   : > { %p2001_p13 = por %p2000_p10, %p1999_p11 }
  0x2f   : > { %p1995_p12 = pneg %p1994_p7 }
  0x30   : > { %1869 = dma.hbm_to_vmem [thread:$0]  (!%p2233_p2), %s2506_s1, 6144, %s237_s20, [#allocation8], %s2099_s13, %s2099_s13, %s2100_s19  }
  0x31   : > { %p2002_p1 = pnand %p2001_p13, %p1995_p12 }
  0x33   : > { %2005 = shalt.err (!%p2002_p1)
}
  0x34   : > { %s2507_s3 = sld [smem:[#allocation25_spill]]  ;;  %s2017_s20 = scalar_lea.vmem %s2239_s8, 2048 }
  0x35   : > { %p2018_p6 = scmp.ne.s32.totalorder %s2239_s8, %s2017_s20  ;;  %p2025_p12 = scmp.lt.s32.totalorder %s2239_s8, %s2239_s8 }
  0x36   : > { %p2026_p11 = scmp.lt.s32.totalorder %s2017_s20, %s2017_s20 }
  0x37   : > { %p2020_p7 = pnand %p2018_p6, %p1956_p3 }
  0x38   : > { %p2027_p10 = por %p2026_p11, %p2025_p12 }
  0x39   : > { %p2021_p9 = pneg %p2020_p7 }
  0x3a   : > { %1872 = dma.hbm_to_vmem [thread:$0]  (!%p2233_p2), %s2507_s3, 6144, %s2237_s22, [#allocation8], %s2099_s13, %s2099_s13, %s2100_s19  }
  0x3b   : > { %p2028_p13 = pnand %p2027_p10, %p2021_p9 }
  0x3d   : > { %2031 = shalt.err (!%p2028_p13)
}
  0x3e   : > { %s2508_s5 = sld [smem:[#allocation26_spill]]  ;;  %p1375_p1 = scmp.ge.s32.totalorder %s2094_s29, 3 }
  0x40   : > { %281 = sbr.rel (%p1375_p1) target bundleno = 82 (0x52), region = 40 }
  0x44   : > { %1875 = dma.hbm_to_vmem [thread:$0]  (!%p2233_p2), %s2508_s5, 2048, %s2239_s8, [#allocation11], %s2099_s13, %s2099_s13, %s2100_s19  }
  0x45   : > { %s285_s22 = sand.u32 1, %s2082_s26   ;;  %s1397_s21 = sshll.u32 %s2090_s28, 8 }
  0x46   : > { %s1376_s30 = sshll.u32 %s285_s22, 5  ;;  %s298_s20 = scalar_lea.hbm %s2484_s0, %s1397_s21 }
  0x47   : > { %s1843_s8 = scalar_select %p2196_p4, [#allocation0], [#allocation17] }
  0x48   : > { %s289_s13 = scalar_lea.vmem [#allocation4], %s1376_s30  ;;  %s2101_s16 = smov 768  }
  0x49   : > { %s311_s19 = sshll.u32 %s289_s13, 4  ;;  %s303_s9 = sld [smem:[%s1843_s8]]   ;;  %s312_s19 = int_to_ptr.vmem [resolvable:$true] %s311_s19 }
  0x4a   : > { %1844 = sst [smem:[#allocation14]] (%p2196_p4), %s2101_s16  ;;  %s2102_s1 = smov 256  }
  0x4b   : > { %1845 = sst [smem:[#allocation14 + $0x1]] (%p2196_p4), %s2102_s1  ;;  %s2103_s3 = smov 2  }
  0x4c   : > { %1846 = sst [smem:[#allocation14 + $0x2]] (%p2196_p4), %s2103_s3  ;;  %s2104_s5 = smov 128  }
  0x4d   : > { %1847 = sst [smem:[#allocation14 + $0x3]] (%p2196_p4), %s2104_s5  ;;  %s2105_s30 = smov 8  }
  0x4e   : > { %1848 = sst [smem:[#allocation14 + $0x4]] (%p2196_p4), %s2104_s5  ;;  %s286_s10 = scalar_lea.sflag [#allocation5], %s285_s22 }
  0x4f   : > { %s1379_s21 = sshll.u32 %s303_s9, 26  ;;  %1849 = sst [smem:[#allocation14 + $0x5]] (%p2196_p4), %s2105_s30 }
  0x50   : > { %s1380_s23 = sadd.s32 134217728, %s1379_s21  ;;  %s2106_s8 = smov 131072  }
  0x51   : > { %1850 = dma.general (%p2196_p4), %s298_s20, 512, %s312_s19, %s286_s10, %s2106_s8, [#allocation14], %s1380_s23, 0  }
  0x52 PF: > { %336 = sbr.rel (%p2225_p0) target bundleno = 670 (0x29e), region = 48  ;;  %s2302_s1 = sand.u32 (!%p2225_p0), 1, %s2078_s25  }
  0x53   : > { %s1382_s3 = sshll.u32 (!%p2225_p0), %s2302_s1, 5  ;;  %s339_s5 = scalar_lea.sflag (!%p2225_p0), [#allocation5], %s2302_s1 }
  0x54   : > { %s2306_s13 = scalar_lea.vmem (!%p2225_p0), [#allocation4], %s1382_s3 }
  0x57   : > { %2057 = dma.done.wait (%p2208_p8), %s339_s5, 512  }
  0x58   : > { %2059 = vsyncadd (%p2208_p8), %s339_s5, 4294966784 }
  0x59   : > { %2061 = dma.done.wait (%p2200_p5), [#allocation8], 12288  }
  0x5a   : > { %2063 = vsyncadd (%p2200_p5), [#allocation8], 4294955008 }
  0x5b   : > { %2065 = dma.done.wait (%p2200_p5), [#allocation11], 2048  }
  0x5c   : > { %2067 = vsyncadd (%p2200_p5), [#allocation11], 4294965248  ;;  %s2320_s11 = scalar_lea.vmem [#allocation12], %s1382_s3  ;;  %p1387_p4 = scmp.ne.s32.totalorder %s2086_s27, 0 }
  0x5e   : > { %392 = sbr.rel (%p1387_p4) target bundleno = 102 (0x66), region = 68 }
  0x63   : > { %v2107_v0 = vmov 0.0  }
  0x64   : > { %393 = vst [vmem:[#allocation2] sm:$0xf] %v2107_v0  ;;  %394 = vst [vmem:[#allocation2 + $0x18] sm:$0xf] %v2107_v0 }
  0x65   : > { %395 = vst [vmem:[#allocation3] sm:$0xf] %v2107_v0  ;;  %396 = vst [vmem:[#allocation3 + $0x18] sm:$0xf] %v2107_v0 }
  0x66 PF: > { %p1388_p8 = scmp.le.s32.totalorder %s2086_s27, 0 }
  0x68   : > { %400 = sbr.rel (%p1388_p8) target bundleno = 112 (0x70), region = 72 }
  0x6d   : > { %v401_v1 = vld [vmem:[#allocation2 + $0x10] sm:$0xf]  ;;  %v402_v2 = vld [vmem:[#allocation2 + $0x28] sm:$0xf]  ;;  %v405_v3 = vld [vmem:[#allocation3 + $0x10] sm:$0xf] }
  0x6e   : > { %403 = vst [vmem:[#allocation2] sm:$0xf] %v401_v1  ;;  %404 = vst [vmem:[#allocation2 + $0x18] sm:$0xf] %v402_v2  ;;  %v406_v4 = vld [vmem:[#allocation3 + $0x28] sm:$0xf] }
  0x6f   : > { %407 = vst [vmem:[#allocation3] sm:$0xf] %v405_v3  ;;  %408 = vst [vmem:[#allocation3 + $0x18] sm:$0xf] %v406_v4 }
  0x70 PF: > { %v457_v5 = vld [vmem:[#allocation7 + $0xf8] sm:$0xff]  ;;  %v456_v7 = vld [vmem:[#allocation7 + $0xf0] sm:$0xff]  ;;  %v455_v9 = vld [vmem:[#allocation7 + $0xe8] sm:$0xff]  ;;  %s1214_s9 = scalar_lea.sflag [#allocation6], %s2302_s1 }
  0x71   : > { %v436_v6 = vld [vmem:[#allocation7 + $0x78] sm:$0xff]  ;;  %1539 = vmatprep.subr.mxu0 %v457_v5  ;;  %v435_v8 = vld [vmem:[#allocation7 + $0x70] sm:$0xff]  ;;  %v434_v10 = vld [vmem:[#allocation7 + $0x68] sm:$0xff] }
  0x72   : > { %1577 = vmatprep.subr.mxu1 %v436_v6  ;;  %1540 = vmatpush3.msra.mxu0 %v457_v5  ;;  %v454_v11 = vld [vmem:[#allocation7 + $0xe0] sm:$0xff]  ;;  %v453_v13 = vld [vmem:[#allocation7 + $0xd8] sm:$0xff]  ;;  %v452_v15 = vld [vmem:[#allocation7 + $0xd0] sm:$0xff] }
  0x73   : > { %1578 = vmatpush3.msra.mxu1 %v436_v6  ;;  %1541 = vmatprep.subr.mxu0 %v456_v7  ;;  %v433_v12 = vld [vmem:[#allocation7 + $0x60] sm:$0xff]  ;;  %v432_v14 = vld [vmem:[#allocation7 + $0x58] sm:$0xff]  ;;  %v431_v16 = vld [vmem:[#allocation7 + $0x50] sm:$0xff] }
  0x74   : > { %1579 = vmatprep.subr.mxu1 %v435_v8  ;;  %1542 = vmatpush3.msra.mxu0 %v456_v7  ;;  %v451_v17 = vld [vmem:[#allocation7 + $0xc8] sm:$0xff]  ;;  %v2325_v19 = vld [vmem:[%s2306_s13] sm:$0xff]  ;;  %v449_v23 = vld [vmem:[#allocation7 + $0xb8] sm:$0xff] }
  0x75   : > { %1580 = vmatpush3.msra.mxu1 %v435_v8  ;;  %1543 = vmatprep.subr.mxu0 %v455_v9  ;;  %v430_v18 = vld [vmem:[#allocation7 + $0x48] sm:$0xff]  ;;  %413 = vst [vmem:[#allocation2 + $0x4] sm:$0xff] %v2325_v19  ;;  %v450_v21 = vld [vmem:[#allocation7 + $0xc0] sm:$0xff]  ;;  %v428_v24 = vld [vmem:[#allocation7 + $0x38] sm:$0xff] }
  0x76   : > { %1581 = vmatprep.subr.mxu1 %v434_v10  ;;  %1544 = vmatpush3.msra.mxu0 %v455_v9  ;;  %v2329_v20 = vld [vmem:[%s2306_s13 + $0x8] sm:$0xff]  ;;  %v429_v22 = vld [vmem:[#allocation7 + $0x40] sm:$0xff]  ;;  %v2333_v25 = vld [vmem:[%s2306_s13 + $0x10] sm:$0xff] }
  0x77   : > { %1582 = vmatpush3.msra.mxu1 %v434_v10  ;;  %1545 = vmatprep.subr.mxu0 %v454_v11  ;;  %414 = vst [vmem:[#allocation2 + $0xc] sm:$0xff] %v2329_v20  ;;  %v448_v26 = vld [vmem:[#allocation7 + $0xb0] sm:$0xff]  ;;  %415 = vst [vmem:[#allocation2 + $0x1c] sm:$0xff] %v2333_v25  ;;  %v2337_v28 = vld [vmem:[%s2306_s13 + $0x18] sm:$0xff] }
  0x78   : > { %1583 = vmatprep.subr.mxu1 %v433_v12  ;;  %1546 = vmatpush3.msra.mxu0 %v454_v11  ;;  %v427_v27 = vld [vmem:[#allocation7 + $0x30] sm:$0xff]  ;;  %416 = vst [vmem:[#allocation2 + $0x24] sm:$0xff] %v2337_v28  ;;  %v447_v29 = vld [vmem:[#allocation7 + $0xa8] sm:$0xff]  ;;  %v446_v31 = vld [vmem:[#allocation7 + $0xa0] sm:$0xff] }
  0x79   : > { %1584 = vmatpush3.msra.mxu1 %v433_v12  ;;  %1547 = vmatprep.subr.mxu0 %v453_v13  ;;  %v426_v30 = vld [vmem:[#allocation7 + $0x28] sm:$0xff]  ;;  %v425_v32 = vld [vmem:[#allocation7 + $0x20] sm:$0xff]  ;;  %v445_v33 = vld [vmem:[#allocation7 + $0x98] sm:$0xff] }
  0x7a   : > { %1585 = vmatprep.subr.mxu1 %v432_v14  ;;  %1548 = vmatpush3.msra.mxu0 %v453_v13  ;;  %v424_v34 = vld [vmem:[#allocation7 + $0x18] sm:$0xff]  ;;  %v444_v35 = vld [vmem:[#allocation7 + $0x90] sm:$0xff]  ;;  %v443_v37 = vld [vmem:[#allocation7 + $0x88] sm:$0xff] }
  0x7b   : > { %1586 = vmatpush3.msra.mxu1 %v432_v14  ;;  %1549 = vmatprep.subr.mxu0 %v452_v15  ;;  %v423_v36 = vld [vmem:[#allocation7 + $0x10] sm:$0xff]  ;;  %v422_v38 = vld [vmem:[#allocation7 + $0x8] sm:$0xff]  ;;  %v442_v39 = vld [vmem:[#allocation7 + $0x80] sm:$0xff] }
  0x7c   : > { %1587 = vmatprep.subr.mxu1 %v431_v16  ;;  %1550 = vmatpush3.msra.mxu0 %v452_v15  ;;  %v421_v40 = vld [vmem:[#allocation7] sm:$0xff]  ;;  %v648_v45 = vld [vmem:[#allocation7 + $0x178] sm:$0xff]  ;;  %v647_v48 = vld [vmem:[#allocation7 + $0x170] sm:$0xff] }
  0x7d   : > { %1588 = vmatpush3.msra.mxu1 %v431_v16  ;;  %1551 = vmatprep.subr.mxu0 %v451_v17  ;;  %v437_v41 = vld [vmem:[#allocation2 + $0x2] sm:$0xff]  ;;  %v644_v53 = vld [vmem:[#allocation7 + $0x158] sm:$0xff]  ;;  %v643_v54 = vld [vmem:[#allocation7 + $0x150] sm:$0xff] }
  0x7e   : > { %1589 = vmatprep.subr.mxu1 %v430_v18  ;;  %1552 = vmatpush3.msra.mxu0 %v451_v17  ;;  %v417_v42 = vld [vmem:[#allocation2] sm:$0xff]  ;;  %v438_v43 = vld [vmem:[#allocation2 + $0xa] sm:$0xff]  ;;  %v419_v47 = vld [vmem:[#allocation2 + $0x18] sm:$0xff] }
  0x7f   : > { %1590 = vmatpush3.msra.mxu1 %v430_v18  ;;  %1553 = vmatprep.subr.mxu0 %v450_v21  ;;  %v418_v44 = vld [vmem:[#allocation2 + $0x8] sm:$0xff]  ;;  %v439_v46 = vld [vmem:[#allocation2 + $0x1a] sm:$0xff]  ;;  %v639_v58 = vld [vmem:[#allocation7 + $0x130] sm:$0xff] }
  0x80   : > { %1591 = vmatprep.subr.mxu1 %v429_v22  ;;  %1554 = vmatpush3.msra.mxu0 %v450_v21  ;;  %v420_v49 = vld [vmem:[#allocation2 + $0x20] sm:$0xff]  ;;  %v646_v50 = vld [vmem:[#allocation7 + $0x168] sm:$0xff]  ;;  %v640_v57 = vld [vmem:[#allocation7 + $0x138] sm:$0xff] }
  0x81   : > { %1592 = vmatpush3.msra.mxu1 %v429_v22  ;;  %1555 = vmatprep.subr.mxu0 %v449_v23  ;;  %v440_v51 = vld [vmem:[#allocation2 + $0x22] sm:$0xff]  ;;  %v636_v61 = vld [vmem:[#allocation7 + $0x118] sm:$0xff]  ;;  %v635_v62 = vld [vmem:[#allocation7 + $0x110] sm:$0xff] }
  0x82   : > { %1593 = vmatprep.subr.mxu1 %v428_v24  ;;  %1556 = vmatpush3.msra.mxu0 %v449_v23  ;;  %v645_v52 = vld [vmem:[#allocation7 + $0x160] sm:$0xff]  ;;  %v642_v55 = vld [vmem:[#allocation7 + $0x148] sm:$0xff]  ;;  %v797_v1 = vld [vmem:[#allocation9 + $0xf8] sm:$0xff] }
  0x83   : > { %1594 = vmatpush3.msra.mxu1 %v428_v24  ;;  %1557 = vmatprep.subr.mxu0 %v448_v26  ;;  %v641_v56 = vld [vmem:[#allocation7 + $0x140] sm:$0xff]  ;;  %v638_v59 = vld [vmem:[#allocation7 + $0x128] sm:$0xff]  ;;  %v776_v2 = vld [vmem:[#allocation9 + $0x78] sm:$0xff] }
  0x84   : > { %1595 = vmatprep.subr.mxu1 %v427_v27  ;;  %1558 = vmatpush3.msra.mxu0 %v448_v26  ;;  %v637_v60 = vld [vmem:[#allocation7 + $0x120] sm:$0xff]  ;;  %v634_v63 = vld [vmem:[#allocation7 + $0x108] sm:$0xff]  ;;  %v796_v3 = vld [vmem:[#allocation9 + $0xf0] sm:$0xff] }
  0x85   : > { %1596 = vmatpush3.msra.mxu1 %v427_v27  ;;  %1559 = vmatprep.subr.mxu0 %v447_v29  ;;  %v633_v0 = vld [vmem:[#allocation7 + $0x100] sm:$0xff]  ;;  %v775_v4 = vld [vmem:[#allocation9 + $0x70] sm:$0xff]  ;;  %v795_v5 = vld [vmem:[#allocation9 + $0xe8] sm:$0xff] }
  0x86   : > { %1597 = vmatprep.subr.mxu1 %v426_v30  ;;  %1560 = vmatpush3.msra.mxu0 %v447_v29  ;;  %v774_v6 = vld [vmem:[#allocation9 + $0x68] sm:$0xff]  ;;  %v794_v7 = vld [vmem:[#allocation9 + $0xe0] sm:$0xff]  ;;  %v793_v9 = vld [vmem:[#allocation9 + $0xd8] sm:$0xff] }
  0x87   : > { %1598 = vmatpush3.msra.mxu1 %v426_v30  ;;  %1561 = vmatprep.subr.mxu0 %v446_v31  ;;  %v773_v8 = vld [vmem:[#allocation9 + $0x60] sm:$0xff]  ;;  %v772_v10 = vld [vmem:[#allocation9 + $0x58] sm:$0xff]  ;;  %v792_v11 = vld [vmem:[#allocation9 + $0xd0] sm:$0xff] }
  0x88   : > { %1599 = vmatprep.subr.mxu1 %v425_v32  ;;  %1562 = vmatpush3.msra.mxu0 %v446_v31  ;;  %v771_v12 = vld [vmem:[#allocation9 + $0x50] sm:$0xff]  ;;  %v791_v13 = vld [vmem:[#allocation9 + $0xc8] sm:$0xff]  ;;  %v790_v15 = vld [vmem:[#allocation9 + $0xc0] sm:$0xff] }
  0x89   : > { %1600 = vmatpush3.msra.mxu1 %v425_v32  ;;  %1563 = vmatprep.subr.mxu0 %v445_v33  ;;  %v770_v14 = vld [vmem:[#allocation9 + $0x48] sm:$0xff]  ;;  %v769_v16 = vld [vmem:[#allocation9 + $0x40] sm:$0xff]  ;;  %v789_v17 = vld [vmem:[#allocation9 + $0xb8] sm:$0xff] }
  0x8a   : > { %1601 = vmatprep.subr.mxu1 %v424_v34  ;;  %1564 = vmatpush3.msra.mxu0 %v445_v33  ;;  %v768_v18 = vld [vmem:[#allocation9 + $0x38] sm:$0xff]  ;;  %v788_v21 = vld [vmem:[#allocation9 + $0xb0] sm:$0xff]  ;;  %v787_v23 = vld [vmem:[#allocation9 + $0xa8] sm:$0xff] }
  0x8b   : > { %1602 = vmatpush3.msra.mxu1 %v424_v34  ;;  %1565 = vmatprep.subr.mxu0 %v444_v35  ;;  %v767_v22 = vld [vmem:[#allocation9 + $0x30] sm:$0xff]  ;;  %v766_v24 = vld [vmem:[#allocation9 + $0x28] sm:$0xff]  ;;  %v786_v26 = vld [vmem:[#allocation9 + $0xa0] sm:$0xff] }
  0x8c   : > { %1603 = vmatprep.subr.mxu1 %v423_v36  ;;  %1566 = vmatpush3.msra.mxu0 %v444_v35  ;;  %v765_v27 = vld [vmem:[#allocation9 + $0x20] sm:$0xff]  ;;  %v785_v29 = vld [vmem:[#allocation9 + $0x98] sm:$0xff]  ;;  %v784_v31 = vld [vmem:[#allocation9 + $0x90] sm:$0xff] }
  0x8d   : > { %1604 = vmatpush3.msra.mxu1 %v423_v36  ;;  %1567 = vmatprep.subr.mxu0 %v443_v37  ;;  %v764_v30 = vld [vmem:[#allocation9 + $0x18] sm:$0xff]  ;;  %v763_v32 = vld [vmem:[#allocation9 + $0x10] sm:$0xff]  ;;  %v783_v33 = vld [vmem:[#allocation9 + $0x88] sm:$0xff] }
  0x8e   : > { %1605 = vmatprep.subr.mxu1 %v422_v38  ;;  %1568 = vmatpush3.msra.mxu0 %v443_v37  ;;  %v762_v34 = vld [vmem:[#allocation9 + $0x8] sm:$0xff]  ;;  %v782_v35 = vld [vmem:[#allocation9 + $0x80] sm:$0xff]  ;;  %v988_v37 = vld [vmem:[#allocation9 + $0x178] sm:$0xff] }
  0x8f   : > { %1606 = vmatpush3.msra.mxu1 %v422_v38  ;;  %1569 = vmatprep.subr.mxu0 %v442_v39  ;;  %v761_v36 = vld [vmem:[#allocation9] sm:$0xff]  ;;  %v2344_v38 = vld [vmem:[#allocation10 + $0x78] sm:$0xff] }
  0x90   : > { %1607 = vmatprep.subr.mxu1 %v421_v40  ;;  %1570 = vmatpush3.msra.mxu0 %v442_v39 }
  0x91   : > { %1571 = vmatprep.mubr.f32.mxu0 %v437_v41  ;;  %1608 = vmatpush3.msra.mxu1 %v421_v40 }
  0x92   : > { %1609 = vmatprep.mubr.f32.mxu1 %v417_v42  ;;  %1572 = vmatmul.mubr.f32.vlgmr.msra.gmra.mxu0 %v438_v43 }
  0x93   : > { %1610 = vmatmul.mubr.f32.vlgmr.msra.gmra.mxu1 %v418_v44  ;;  %1615 = vmatprep.subr.mxu0 %v648_v45 }
  0x94   : > { %1574 = vmatprep.mubr.f32.mxu0 %v439_v46  ;;  %1616 = vmatpush3.msra.mxu0 %v648_v45 }
  0x95   : > { %1612 = vmatprep.mubr.f32.mxu1 %v419_v47  ;;  %1617 = vmatprep.subr.mxu0 %v647_v48 }
  0x96   : > { %1618 = vmatpush3.msra.mxu0 %v647_v48  ;;  %1653 = vmatprep.subr.mxu1 %v797_v1  ;;  %v1389_v48 = vld [vmem:[%s2486_s2] ss:$0 sm:$0xff] }
  0x97   : > { %1613 = vmatmul.mubr.f32.gmra.mxu1 %v420_v49  ;;  %1619 = vmatprep.subr.mxu0 %v646_v50 }
  0x98   : > { %1575 = vmatmul.mubr.f32.gmra.mxu0 %v440_v51  ;;  %1654 = vmatpush3.msra.mxu1 %v797_v1 }
  0x99   : > { %1620 = vmatpush3.msra.mxu0 %v646_v50  ;;  %1647 = vmatprep.mubr.f32.mxu0 %v2325_v19 }
  0x9a   : > { %1621 = vmatprep.subr.mxu0 %v645_v52  ;;  %1655 = vmatprep.subr.mxu1 %v796_v3 }
  0x9b   : > { %1622 = vmatpush3.msra.mxu0 %v645_v52  ;;  %1656 = vmatpush3.msra.mxu1 %v796_v3 }
  0x9c   : > { %1623 = vmatprep.subr.mxu0 %v644_v53  ;;  %1657 = vmatprep.subr.mxu1 %v795_v5 }
  0x9d   : > { %1624 = vmatpush3.msra.mxu0 %v644_v53  ;;  %1658 = vmatpush3.msra.mxu1 %v795_v5 }
  0x9e   : > { %1625 = vmatprep.subr.mxu0 %v643_v54  ;;  %1659 = vmatprep.subr.mxu1 %v794_v7 }
  0x9f   : > { %1626 = vmatpush3.msra.mxu0 %v643_v54  ;;  %1660 = vmatpush3.msra.mxu1 %v794_v7 }
  0xa0   : > { %1627 = vmatprep.subr.mxu0 %v642_v55  ;;  %1661 = vmatprep.subr.mxu1 %v793_v9 }
  0xa1   : > { %1628 = vmatpush3.msra.mxu0 %v642_v55  ;;  %1662 = vmatpush3.msra.mxu1 %v793_v9  ;;  %v2365_v9 = vld [vmem:[#allocation10 + $0x70] sm:$0xff] }
  0xa2   : > { %1629 = vmatprep.subr.mxu0 %v641_v56  ;;  %1663 = vmatprep.subr.mxu1 %v792_v11 }
  0xa3   : > { %1630 = vmatpush3.msra.mxu0 %v641_v56  ;;  %1664 = vmatpush3.msra.mxu1 %v792_v11 }
  0xa4   : > { %1631 = vmatprep.subr.mxu0 %v640_v57  ;;  %1665 = vmatprep.subr.mxu1 %v791_v13 }
  0xa5   : > { %1632 = vmatpush3.msra.mxu0 %v640_v57  ;;  %1666 = vmatpush3.msra.mxu1 %v791_v13 }
  0xa6   : > { %1633 = vmatprep.subr.mxu0 %v639_v58  ;;  %1667 = vmatprep.subr.mxu1 %v790_v15 }
  0xa7   : > { %1634 = vmatpush3.msra.mxu0 %v639_v58  ;;  %1668 = vmatpush3.msra.mxu1 %v790_v15  ;;  %v985_v15 = vld [vmem:[#allocation9 + $0x160] sm:$0xff] }
  0xa8   : > { %1635 = vmatprep.subr.mxu0 %v638_v59  ;;  %1669 = vmatprep.subr.mxu1 %v789_v17 }
  0xa9   : > { %1636 = vmatpush3.msra.mxu0 %v638_v59  ;;  %1670 = vmatpush3.msra.mxu1 %v789_v17  ;;  %v984_v17 = vld [vmem:[#allocation9 + $0x158] sm:$0xff] }
  0xaa   : > { %1637 = vmatprep.subr.mxu0 %v637_v60  ;;  %1671 = vmatprep.subr.mxu1 %v788_v21 }
  0xab   : > { %1638 = vmatpush3.msra.mxu0 %v637_v60  ;;  %1672 = vmatpush3.msra.mxu1 %v788_v21  ;;  %v983_v21 = vld [vmem:[#allocation9 + $0x150] sm:$0xff] }
  0xac   : > { %1639 = vmatprep.subr.mxu0 %v636_v61  ;;  %1673 = vmatprep.subr.mxu1 %v787_v23 }
  0xad   : > { %1640 = vmatpush3.msra.mxu0 %v636_v61  ;;  %1674 = vmatpush3.msra.mxu1 %v787_v23  ;;  %v982_v23 = vld [vmem:[#allocation9 + $0x148] sm:$0xff] }
  0xae   : > { %1641 = vmatprep.subr.mxu0 %v635_v62  ;;  %1675 = vmatprep.subr.mxu1 %v786_v26 }
  0xaf   : > { %1642 = vmatpush3.msra.mxu0 %v635_v62  ;;  %1676 = vmatpush3.msra.mxu1 %v786_v26  ;;  %v981_v26 = vld [vmem:[#allocation9 + $0x140] sm:$0xff] }
  0xb0   : > { %1643 = vmatprep.subr.mxu0 %v634_v63  ;;  %1677 = vmatprep.subr.mxu1 %v785_v29 }
  0xb1   : > { %1644 = vmatpush3.msra.mxu0 %v634_v63  ;;  %1678 = vmatpush3.msra.mxu1 %v785_v29  ;;  %v980_v29 = vld [vmem:[#allocation9 + $0x138] sm:$0xff] }
  0xb2   : > { %1645 = vmatprep.subr.mxu0 %v633_v0  ;;  %1679 = vmatprep.subr.mxu1 %v784_v31 }
  0xb3   : > { %1646 = vmatpush3.msra.mxu0 %v633_v0  ;;  %1680 = vmatpush3.msra.mxu1 %v784_v31  ;;  %v979_v31 = vld [vmem:[#allocation9 + $0x130] sm:$0xff] }
  0xb4   : > { %1648 = vmatmul.mubr.f32.vlgmr.msra.gmra.mxu0 %v2329_v20  ;;  %1691 = vmatprep.subr.mxu0 %v776_v2 }
  0xb5   : > { %1650 = vmatprep.mubr.f32.mxu0 %v2333_v25  ;;  %1692 = vmatpush3.msra.mxu0 %v776_v2 }
  0xb6   : > { %1693 = vmatprep.subr.mxu0 %v775_v4  ;;  %1681 = vmatprep.subr.mxu1 %v783_v33 }
  0xb7   : > { %1694 = vmatpush3.msra.mxu0 %v775_v4  ;;  %1682 = vmatpush3.msra.mxu1 %v783_v33  ;;  %v978_v33 = vld [vmem:[#allocation9 + $0x128] sm:$0xff] }
  0xb8   : > { %1651 = vmatmul.mubr.f32.gmra.mxu0 %v2337_v28  ;;  %1695 = vmatprep.subr.mxu0 %v774_v6 }
  0xb9   : > { %1696 = vmatpush3.msra.mxu0 %v774_v6  ;;  %1683 = vmatprep.subr.mxu1 %v782_v35 }
  0xba   : > { %1697 = vmatprep.subr.mxu0 %v773_v8  ;;  %1684 = vmatpush3.msra.mxu1 %v782_v35  ;;  %v977_v35 = vld [vmem:[#allocation9 + $0x120] sm:$0xff] }
  0xbb   : > { %1698 = vmatpush3.msra.mxu0 %v773_v8  ;;  %1729 = vmatprep.subr.mxu1 %v988_v37  ;;  %v987_v8 = vld [vmem:[#allocation9 + $0x170] sm:$0xff] }
  0xbc   : > { %1699 = vmatprep.subr.mxu0 %v772_v10 }
  0xbd   : > { %1700 = vmatpush3.msra.mxu0 %v772_v10  ;;  %v986_v10 = vld [vmem:[#allocation9 + $0x168] sm:$0xff] }
  0xbe   : > { %1701 = vmatprep.subr.mxu0 %v771_v12 }
  0xbf   : > { %1702 = vmatpush3.msra.mxu0 %v771_v12 }
  0xc0   : > { %1703 = vmatprep.subr.mxu0 %v770_v14 }
  0xc1   : > { %1704 = vmatpush3.msra.mxu0 %v770_v14 }
  0xc2   : > { %1705 = vmatprep.subr.mxu0 %v769_v16 }
  0xc3   : > { %1706 = vmatpush3.msra.mxu0 %v769_v16  ;;  %v2369_v16 = vld [vmem:[#allocation10 + $0x68] sm:$0xff] }
  0xc4   : > { %1707 = vmatprep.subr.mxu0 %v768_v18 }
  0xc5   : > { %1708 = vmatpush3.msra.mxu0 %v768_v18  ;;  %v2372_v18 = vld [vmem:[#allocation10 + $0x60] sm:$0xff] }
  0xc6   : > { %1709 = vmatprep.subr.mxu0 %v767_v22 }
  0xc7   : > { %1710 = vmatpush3.msra.mxu0 %v767_v22  ;;  %v2376_v22 = vld [vmem:[#allocation10 + $0x58] sm:$0xff] }
  0xc8   : > { %1711 = vmatprep.subr.mxu0 %v766_v24 }
  0xc9   : > { %1712 = vmatpush3.msra.mxu0 %v766_v24  ;;  %v2380_v24 = vld [vmem:[#allocation10 + $0x50] sm:$0xff] }
  0xca   : > { %1713 = vmatprep.subr.mxu0 %v765_v27 }
  0xcb   : > { %1714 = vmatpush3.msra.mxu0 %v765_v27  ;;  %v2384_v27 = vld [vmem:[#allocation10 + $0x48] sm:$0xff] }
  0xcc   : > { %1715 = vmatprep.subr.mxu0 %v764_v30 }
  0xcd   : > { %1716 = vmatpush3.msra.mxu0 %v764_v30  ;;  %v2388_v30 = vld [vmem:[#allocation10 + $0x40] sm:$0xff] }
  0xce   : > { %1717 = vmatprep.subr.mxu0 %v763_v32 }
  0xcf   : > { %1718 = vmatpush3.msra.mxu0 %v763_v32  ;;  %v2392_v32 = vld [vmem:[#allocation10 + $0x38] sm:$0xff] }
  0xd0   : > { %1719 = vmatprep.subr.mxu0 %v762_v34 }
  0xd1   : > { %1720 = vmatpush3.msra.mxu0 %v762_v34  ;;  %v2396_v34 = vld [vmem:[#allocation10 + $0x30] sm:$0xff] }
  0xd2   : > { %1721 = vmatprep.subr.mxu0 %v761_v36 }
  0xd3   : > { %1722 = vmatpush3.msra.mxu0 %v761_v36  ;;  %v1098_v36 = vld [vmem:[#allocation10 + $0x28] sm:$0xff] }
  0xd4   : > { %1767 = vmatprep.subr.mxu0 %v2344_v38 }
 0x152   : > { %v1573_v39 = vpop.f32.mrf.mxu0 }
 0x153   : > { %v1611_v40 = vpop.f32.mrf.mxu1 }
 0x154   : > { %v524_v41 = vpop.f32.mrf.mxu0  ;;  %v615_v46 = vadd.f32 %v1611_v40, %v1573_v39  ;;  %v1097_v39 = vld [vmem:[#allocation10 + $0x20] sm:$0xff]  ;;  %v975_v40 = vld [vmem:[#allocation9 + $0x110] sm:$0xff] }
 0x155   : > { %v609_v43 = vpop.f32.mrf.mxu1 }
 0x156   : > { %v610_v49 = vadd.f32 %v609_v43, %v524_v41  ;;  %v1096_v41 = vld [vmem:[#allocation10 + $0x18] sm:$0xff]  ;;  %v1095_v43 = vld [vmem:[#allocation10 + $0x10] sm:$0xff] }
 0x157   : > { %v1614_v44 = vpop.f32.mrf.mxu1 }
 0x158   : > { %v1576_v42 = vpop.f32.mrf.mxu0 }
 0x159   : > { %v619_v51 = vpop.f32.mrf.mxu1  ;;  %v625_v53 = vadd.f32 %v1614_v44, %v1576_v42  ;;  %v974_v42 = vld [vmem:[#allocation9 + $0x108] sm:$0xff]  ;;  %v973_v44 = vld [vmem:[#allocation9 + $0x100] sm:$0xff] }
 0x15a   : > { %v534_v45 = vpop.f32.mrf.mxu0 }
 0x15b   : > { %v620_v57 = vadd.f32 %v619_v51, %v534_v45  ;;  %v1094_v45 = vld [vmem:[#allocation10 + $0x8] sm:$0xff] }
 0x174   : > { %v1649_v47 = vpop.f32.mrf.mxu0 }
 0x175   : > { %v735_v50 = vadd.f32 %v1649_v47, %v615_v46  ;;  %v1093_v46 = vld [vmem:[#allocation10] sm:$0xff] }
 0x176   : > { %v715_v52 = vpop.f32.mrf.mxu0 }
 0x177   : > { %v2350_v54 = vadd.f32 %v1389_v48, %v735_v50  ;;  %v734_v55 = vadd.f32 %v715_v52, %v610_v49  ;;  %v1390_v52 = vld [vmem:[%s2488_s4] ss:$0 sm:$0xff] }
 0x178   : > { %v1652_v56 = vpop.f32.mrf.mxu0 }
 0x179   : > { %v750_v58 = vmax.f32 %v2350_v54, 0.0  ;;  %v745_v59 = vadd.f32 %v1389_v48, %v734_v55  ;;  %v737_v60 = vadd.f32 %v1652_v56, %v625_v53 }
 0x17a   : > { %v725_v61 = vpop.f32.mrf.mxu0 }
 0x17b   : > { %754 = vst [vmem:[#allocation3 + $0xc] sm:$0xff] %v750_v58  ;;  %v749_v62 = vmax.f32 %v745_v59, 0.0  ;;  %v2355_v63 = vadd.f32 %v1389_v48, %v737_v60  ;;  %v736_v0 = vadd.f32 %v725_v61, %v620_v57 }
 0x17d   : > { %753 = vst [vmem:[#allocation3 + $0x4] sm:$0xff] %v749_v62  ;;  %v752_v1 = vmax.f32 %v2355_v63, 0.0  ;;  %v2358_v2 = vadd.f32 %v1389_v48, %v736_v0 }
 0x17f   : > { %756 = vst [vmem:[#allocation3 + $0x24] sm:$0xff] %v752_v1  ;;  %v751_v3 = vmax.f32 %v2358_v2, 0.0 }
 0x181   : > { %755 = vst [vmem:[#allocation3 + $0x1c] sm:$0xff] %v751_v3 }
 0x184   : > { %v777_v4 = vld [vmem:[#allocation3 + $0x2] sm:$0xff]  ;;  %v778_v6 = vld [vmem:[#allocation3 + $0xa] sm:$0xff] }
 0x185   : > { %v757_v5 = vld [vmem:[#allocation3] sm:$0xff]  ;;  %1685 = vmatprep.mubr.f32.mxu1 %v777_v4  ;;  %v758_v7 = vld [vmem:[#allocation3 + $0x8] sm:$0xff] }
 0x186   : > { %1723 = vmatprep.mubr.f32.mxu0 %v757_v5  ;;  %1686 = vmatmul.mubr.f32.vlgmr.msra.gmra.mxu1 %v778_v6 }
 0x187   : > { %1724 = vmatmul.mubr.f32.vlgmr.msra.gmra.mxu0 %v758_v7  ;;  %1730 = vmatpush3.msra.mxu1 %v988_v37  ;;  %v976_v37 = vld [vmem:[#allocation9 + $0x118] sm:$0xff] }
 0x188   : > { %1768 = vmatpush3.msra.mxu0 %v2344_v38  ;;  %1731 = vmatprep.subr.mxu1 %v987_v8  ;;  %v779_v11 = vld [vmem:[#allocation3 + $0x1a] sm:$0xff]  ;;  %v780_v13 = vld [vmem:[#allocation3 + $0x22] sm:$0xff] }
 0x189   : > { %v759_v12 = vld [vmem:[#allocation3 + $0x18] sm:$0xff]  ;;  %1769 = vmatprep.subr.mxu0 %v2365_v9  ;;  %1732 = vmatpush3.msra.mxu1 %v987_v8  ;;  %v760_v14 = vld [vmem:[#allocation3 + $0x20] sm:$0xff] }
 0x18a   : > { %1688 = vmatprep.mubr.f32.mxu1 %v779_v11  ;;  %1726 = vmatprep.mubr.f32.mxu0 %v759_v12 }
 0x18b   : > { %1733 = vmatprep.subr.mxu1 %v986_v10  ;;  %1689 = vmatmul.mubr.f32.gmra.mxu1 %v780_v13 }
 0x18c   : > { %1727 = vmatmul.mubr.f32.gmra.mxu0 %v760_v14  ;;  %1734 = vmatpush3.msra.mxu1 %v986_v10 }
 0x18d   : > { %1761 = vmatprep.mubr.f32.mxu1 %v749_v62  ;;  %1735 = vmatprep.subr.mxu1 %v985_v15 }
 0x18e   : > { %1770 = vmatpush3.msra.mxu0 %v2365_v9  ;;  %1736 = vmatpush3.msra.mxu1 %v985_v15 }
 0x18f   : > { %1771 = vmatprep.subr.mxu0 %v2369_v16  ;;  %1737 = vmatprep.subr.mxu1 %v984_v17 }
 0x190   : > { %1772 = vmatpush3.msra.mxu0 %v2369_v16  ;;  %1738 = vmatpush3.msra.mxu1 %v984_v17 }
 0x191   : > { %1773 = vmatprep.subr.mxu0 %v2372_v18  ;;  %1739 = vmatprep.subr.mxu1 %v983_v21 }
 0x192   : > { %1774 = vmatpush3.msra.mxu0 %v2372_v18  ;;  %1740 = vmatpush3.msra.mxu1 %v983_v21 }
 0x193   : > { %1775 = vmatprep.subr.mxu0 %v2376_v22  ;;  %1741 = vmatprep.subr.mxu1 %v982_v23 }
 0x194   : > { %1776 = vmatpush3.msra.mxu0 %v2376_v22  ;;  %1742 = vmatpush3.msra.mxu1 %v982_v23 }
 0x195   : > { %1777 = vmatprep.subr.mxu0 %v2380_v24  ;;  %1743 = vmatprep.subr.mxu1 %v981_v26 }
 0x196   : > { %1778 = vmatpush3.msra.mxu0 %v2380_v24  ;;  %1744 = vmatpush3.msra.mxu1 %v981_v26 }
 0x197   : > { %1779 = vmatprep.subr.mxu0 %v2384_v27  ;;  %1745 = vmatprep.subr.mxu1 %v980_v29 }
 0x198   : > { %1780 = vmatpush3.msra.mxu0 %v2384_v27  ;;  %1746 = vmatpush3.msra.mxu1 %v980_v29 }
 0x199   : > { %1781 = vmatprep.subr.mxu0 %v2388_v30  ;;  %1747 = vmatprep.subr.mxu1 %v979_v31 }
 0x19a   : > { %1782 = vmatpush3.msra.mxu0 %v2388_v30  ;;  %1748 = vmatpush3.msra.mxu1 %v979_v31 }
 0x19b   : > { %1783 = vmatprep.subr.mxu0 %v2392_v32  ;;  %1749 = vmatprep.subr.mxu1 %v978_v33 }
 0x19c   : > { %1784 = vmatpush3.msra.mxu0 %v2392_v32  ;;  %1750 = vmatpush3.msra.mxu1 %v978_v33 }
 0x19d   : > { %1785 = vmatprep.subr.mxu0 %v2396_v34  ;;  %1751 = vmatprep.subr.mxu1 %v977_v35 }
 0x19e   : > { %1786 = vmatpush3.msra.mxu0 %v2396_v34  ;;  %1752 = vmatpush3.msra.mxu1 %v977_v35 }
 0x19f   : > { %1787 = vmatprep.subr.mxu0 %v1098_v36  ;;  %1753 = vmatprep.subr.mxu1 %v976_v37 }
 0x1a0   : > { %1788 = vmatpush3.msra.mxu0 %v1098_v36  ;;  %1754 = vmatpush3.msra.mxu1 %v976_v37 }
 0x1a1   : > { %1789 = vmatprep.subr.mxu0 %v1097_v39  ;;  %1755 = vmatprep.subr.mxu1 %v975_v40 }
 0x1a2   : > { %1790 = vmatpush3.msra.mxu0 %v1097_v39  ;;  %1756 = vmatpush3.msra.mxu1 %v975_v40 }
 0x1a3   : > { %1791 = vmatprep.subr.mxu0 %v1096_v41  ;;  %1757 = vmatprep.subr.mxu1 %v974_v42 }
 0x1a4   : > { %1792 = vmatpush3.msra.mxu0 %v1096_v41  ;;  %1758 = vmatpush3.msra.mxu1 %v974_v42 }
 0x1a5   : > { %1793 = vmatprep.subr.mxu0 %v1095_v43  ;;  %1759 = vmatprep.subr.mxu1 %v973_v44 }
 0x1a6   : > { %1794 = vmatpush3.msra.mxu0 %v1095_v43  ;;  %1760 = vmatpush3.msra.mxu1 %v973_v44 }
 0x1a7   : > { %1795 = vmatprep.subr.mxu0 %v1094_v45  ;;  %1762 = vmatmul.mubr.f32.vlgmr.msra.gmra.mxu1 %v750_v58  ;;  %v1391_v58 = vld [vmem:[%s2490_s6] ss:$0 sm:$0xff] }
 0x1a8   : > { %1805 = vmatprep.subr.mxu1 %v2344_v38  ;;  %1764 = vmatprep.mubr.f32.mxu1 %v751_v3 }
 0x1a9   : > { %1821 = vmatpush3.msra.mxu1 %v2344_v38  ;;  %1796 = vmatpush3.msra.mxu0 %v1094_v45 }
 0x1aa   : > { %1806 = vmatprep.subr.mxu1 %v2365_v9  ;;  %1797 = vmatprep.subr.mxu0 %v1093_v46 }
 0x1ab   : > { %1822 = vmatpush3.msra.mxu1 %v2365_v9  ;;  %1798 = vmatpush3.msra.mxu0 %v1093_v46 }
 0x1ac   : > { %1799 = vmatprep.mubr.f32.mxu0 %v2325_v19  ;;  %1765 = vmatmul.mubr.f32.gmra.mxu1 %v752_v1 }
 0x1ad   : > { %1807 = vmatprep.subr.mxu1 %v2369_v16  ;;  %1800 = vmatmul.mubr.f32.vlgmr.msra.gmra.mxu0 %v2329_v20 }
 0x1ae   : > { %1823 = vmatpush3.msra.mxu1 %v2369_v16  ;;  %1802 = vmatprep.mubr.f32.mxu1 %v2333_v25 }
 0x1af   : > { %1808 = vmatprep.subr.mxu1 %v2372_v18 }
 0x1b0   : > { %1824 = vmatpush3.msra.mxu1 %v2372_v18 }
 0x1b1   : > { %1809 = vmatprep.subr.mxu1 %v2376_v22 }
 0x1b2   : > { %1825 = vmatpush3.msra.mxu1 %v2376_v22 }
 0x1b3   : > { %1810 = vmatprep.subr.mxu1 %v2380_v24 }
 0x1b4   : > { %1826 = vmatpush3.msra.mxu1 %v2380_v24 }
 0x1b5   : > { %1811 = vmatprep.subr.mxu1 %v2384_v27 }
 0x1b6   : > { %1827 = vmatpush3.msra.mxu1 %v2384_v27 }
 0x1b7   : > { %1812 = vmatprep.subr.mxu1 %v2388_v30 }
 0x1b8   : > { %1828 = vmatpush3.msra.mxu1 %v2388_v30 }
 0x1b9   : > { %1813 = vmatprep.subr.mxu1 %v2392_v32 }
 0x1ba   : > { %1829 = vmatpush3.msra.mxu1 %v2392_v32 }
 0x1bb   : > { %1814 = vmatprep.subr.mxu1 %v2396_v34 }
 0x1bc   : > { %1830 = vmatpush3.msra.mxu1 %v2396_v34 }
 0x1bd   : > { %1815 = vmatprep.subr.mxu1 %v1098_v36 }
 0x1be   : > { %1831 = vmatpush3.msra.mxu1 %v1098_v36 }
 0x1bf   : > { %1816 = vmatprep.subr.mxu1 %v1097_v39 }
 0x1c0   : > { %1832 = vmatpush3.msra.mxu1 %v1097_v39 }
 0x1c1   : > { %1817 = vmatprep.subr.mxu1 %v1096_v41 }
 0x1c2   : > { %1833 = vmatpush3.msra.mxu1 %v1096_v41 }
 0x1c3   : > { %1818 = vmatprep.subr.mxu1 %v1095_v43 }
 0x1c4   : > { %1834 = vmatpush3.msra.mxu1 %v1095_v43 }
 0x1c5   : > { %1819 = vmatprep.subr.mxu1 %v1094_v45 }
 0x1c6   : > { %1835 = vmatpush3.msra.mxu1 %v1094_v45 }
 0x1c7   : > { %1820 = vmatprep.subr.mxu1 %v1093_v46 }
 0x1c8   : > { %1836 = vmatpush3.msra.mxu1 %v1093_v46 }
 0x1c9   : > { %1803 = vmatmul.mubr.f32.vlgmr.msra.gmra.mxu1 %v2337_v28 }
 0x246   : > { %v1687_v19 = vpop.f32.mrf.mxu1 }
 0x247   : > { %v1725_v25 = vpop.f32.mrf.mxu0 }
 0x248   : > { %v864_v20 = vpop.f32.mrf.mxu1  ;;  %v955_v49 = vadd.f32 %v1725_v25, %v1687_v19 }
 0x249   : > { %v949_v47 = vpop.f32.mrf.mxu0 }
 0x24a   : > { %v950_v53 = vadd.f32 %v949_v47, %v864_v20 }
 0x24b   : > { %v1690_v38 = vpop.f32.mrf.mxu1 }
 0x24c   : > { %v1728_v50 = vpop.f32.mrf.mxu0 }
 0x24d   : > { %v874_v48 = vpop.f32.mrf.mxu1  ;;  %v965_v7 = vadd.f32 %v1728_v50, %v1690_v38 }
 0x24e   : > { %v959_v57 = vpop.f32.mrf.mxu0 }
 0x24f   : > { %v960_v9 = vadd.f32 %v959_v57, %v874_v48 }
 0x267   : > { %v1763_v51 = vpop.f32.mrf.mxu1 }
 0x268   : > { %v1075_v54 = vadd.f32 %v1763_v51, %v955_v49 }
 0x269   : > { %v1055_v55 = vpop.f32.mrf.mxu1 }
 0x26a   : > { %v1086_v56 = vadd.f32 %v1390_v52, %v1075_v54  ;;  %v1074_v28 = vadd.f32 %v1055_v55, %v950_v53 }
 0x26c   : > { %v1090_v59 = vmax.f32 %v1086_v56, 0.0  ;;  %v1085_v60 = vadd.f32 %v1390_v52, %v1074_v28  ;;  %v1766_v6 = vpop.f32.mrf.mxu1 }
 0x26d   : > { %v1801_v61 = vpop.f32.mrf.mxu0  ;;  %v1077_v10 = vadd.f32 %v1766_v6, %v965_v7 }
 0x26e   : > { %v1089_v62 = vmax.f32 %v1085_v60, 0.0  ;;  %v1188_v63 = vadd.f32 %v1801_v61, %v1391_v58  ;;  %v1065_v8 = vpop.f32.mrf.mxu1 }
 0x26f   : > { %v1182_v0 = vpop.f32.mrf.mxu0  ;;  %v1076_v11 = vadd.f32 %v1065_v8, %v960_v9  ;;  %v1088_v12 = vadd.f32 %v1390_v52, %v1077_v10 }
 0x270   : > { %v1202_v1 = vadd.f32 %v1188_v63, %v1090_v59  ;;  %v1183_v2 = vadd.f32 %v1391_v58, %v1182_v0 }
 0x271   : > { %v1087_v13 = vadd.f32 %v1390_v52, %v1076_v11  ;;  %v1092_v15 = vmax.f32 %v1088_v12, 0.0 }
 0x272   : > { %v1206_v3 = vmax.f32 %v1202_v1, 0.0  ;;  %v1201_v4 = vadd.f32 %v1183_v2, %v1089_v62 }
 0x273   : > { %v1091_v18 = vmax.f32 %v1087_v13, 0.0 }
 0x274   : > { %1210 = vst [vmem:[%s2320_s11 + $0x8] sm:$0xff] %v1206_v3  ;;  %v1205_v5 = vmax.f32 %v1201_v4, 0.0 }
 0x276   : > { %1209 = vst [vmem:[%s2320_s11] sm:$0xff] %v1205_v5 }
 0x289   : > { %v1804_v14 = vpop.f32.mrf.mxu1 }
 0x28a   : > { %v1198_v16 = vadd.f32 %v1804_v14, %v1391_v58 }
 0x28b   : > { %v1192_v17 = vpop.f32.mrf.mxu1 }
 0x28c   : > { %v1204_v21 = vadd.f32 %v1198_v16, %v1092_v15  ;;  %v1193_v22 = vadd.f32 %v1391_v58, %v1192_v17 }
 0x28e   : > { %v1208_v23 = vmax.f32 %v1204_v21, 0.0  ;;  %v1203_v24 = vadd.f32 %v1193_v22, %v1091_v18 }
 0x290   : > { %1212 = vst [vmem:[%s2320_s11 + $0x18] sm:$0xff] %v1208_v23  ;;  %v1207_v26 = vmax.f32 %v1203_v24, 0.0 }
 0x292   : > { %1211 = vst [vmem:[%s2320_s11 + $0x10] sm:$0xff] %v1207_v26 }
 0x293   : > { %s1398_s16 = sshll.u32 %s2086_s27, 8  ;;  %s1240_s21 = sshll.u32 %s2320_s11, 4  ;;  %s1241_s21 = int_to_ptr.vmem [resolvable:$true] %s1240_s21 }
 0x294   : > { %s1229_s10 = scalar_lea.hbm %s2491_s7, %s1398_s16  ;;  %s2108_s8 = smov 256  }
 0x295   : > { %p2509_p5 = scmp.ne.s32.totalorder %s2501_s15, 0  ;;  %s2109_s1 = smov 768  }
 0x296   : > { %s2110_s3 = smov 2   ;;  %s2111_s5 = smov 128  }
 0x297   : > { %1858 = sst [smem:[#allocation16]] (%p2509_p5), %s2108_s8  ;;  %s2112_s27 = smov 8  }
 0x298   : > { %1859 = sst [smem:[#allocation16 + $0x1]] (%p2509_p5), %s2109_s1  ;;  %s2113_s13 = smov 131072  }
 0x299   : > { %1860 = sst [smem:[#allocation16 + $0x2]] (%p2509_p5), %s2110_s3  ;;  %s2114_s11 = smov 0  }
 0x29a   : > { %1861 = sst [smem:[#allocation16 + $0x3]] (%p2509_p5), %s2111_s5 }
 0x29b   : > { %1862 = sst [smem:[#allocation16 + $0x4]] (%p2509_p5), %s2111_s5 }
 0x29c   : > { %1863 = sst [smem:[#allocation16 + $0x5]] (%p2509_p5), %s2112_s27 }
 0x29d   : > { %1864 = dma.general (%p2509_p5), %s1241_s21, 512, %s1229_s10, %s1214_s9, %s2113_s13, [#allocation16], %s2114_s11, 0  }
 0x29e PF: > { %p1886_p9 = scmp.ge.s32.totalorder %s2094_s29, 2  ;;  %s1268_s12 = sand.u32 1, %s2074_s24  }
 0x29f   : > { %p2510_p0 = scmp.ne.s32.totalorder %s2503_s17, 0  ;;  %s1269_s14 = scalar_lea.sflag [#allocation6], %s1268_s12 }
 0x2a1   : > { %p1877_p2 = pnand %p1886_p9, %p2510_p0 }
 0x2a3   : > { %p1878_p3 = pneg %p1877_p2 }
 0x2a5   : > { %2069 = dma.done.wait (%p1878_p3), %s1269_s14, 512  }
 0x2a6   : > { %2071 = vsyncadd (%p1878_p3), %s1269_s14, 4294966784  ;;  %s25_s29 = sadd.s32 1, %s2094_s29   ;;  %s2511_s18 = sld [smem:[#allocation23_spill]] }
 0x2a7   : > { %p22_p6 = scmp.ge.s32.totalorder %s25_s29, 5   ;;  %s2512_s15 = sld [smem:[#allocation22_spill]] }
 0x2a8   : > { %s2513_s24 = smov %s2078_s25  ;;  %s2514_s25 = smov %s2082_s26 }
 0x2a9   : > { %s2516_s27 = smov %s2090_s28  ;;  %24 = sbr.rel (!%p22_p6) target bundleno = 12 (0xc), region = 127 }
 0x2ac   : > { %s2515_s26 = smov %s2511_s18 }
 0x2ad   : > { %s2517_s28 = smov %s2512_s15 }
 0x2ae   :  { %1274 = vsyncpa [#allocation5], 1 }
 0x2af   :  { %1276 = vsyncpa [#allocation5 + $0x1], 1 }
 0x2b0   :  { %1277 = vsyncpa [#allocation8], 1 }
 0x2b1   :  { %1278 = vsyncpa [#allocation11], 1 }
 0x2b2   :  { %1279 = vsyncpa [#allocation6], 1 }
 0x2b3   :  { %1281 = vsyncpa [#allocation6 + $0x1], 1 }

</bundles_post_ra>
